<compile_context>
chip_gen: v5e
topology: v5e:2x2
jax: 0.10.0
libtpu: 0.0.40
codegen_flags: <defaults>
</compile_context>

<pallas_src>
import jax
import jax.numpy as jnp
from jax.experimental import pallas as pl
from jax.experimental.pallas import tpu as pltpu

H1 = 512   # hidden 1
H2 = 256   # hidden 2


def _leaky_relu(x, slope=0.2):
    return jnp.where(x > 0, x, slope * x)


def _round_up(x, m):
    return ((x + m - 1) // m) * m


def _pick_tm(batch):
    """Batch tile size: small batches pad only to the bf16 sublane multiple
    (16); large batches use big tiles (<=512) but keep the grid length >= 2
    so v7x megacore can split the batch across its two TensorCores."""
    if batch < 256:
        return max(16, _round_up(batch, 16))
    return min(512, _round_up(pl.cdiv(batch, 2), 128))


def mlp_disc_kernel(x_ref, w1_ref, b1_ref, w2_ref, b2_ref, w3_ref, b3_ref, o_ref):
    # Layer 1: cast the f32 x tile to bf16 in-kernel, MXU matmul, f32 acc.
    x = x_ref[...].astype(jnp.bfloat16)
    h1 = jnp.dot(x, w1_ref[...], preferred_element_type=jnp.float32)
    h1 = _leaky_relu(h1 + b1_ref[...])

    # Layer 2: bf16 (TM, 512) @ bf16 (512, 256) -> f32 acc.
    h2 = jnp.dot(h1.astype(jnp.bfloat16), w2_ref[...],
                 preferred_element_type=jnp.float32)
    h2 = _leaky_relu(h2 + b2_ref[...])

    # Layer 3 (N=1): VPU broadcast-multiply + XLU lane reduction, full f32.
    # Avoids a zero-padded MXU matmul and keeps the output tile compact.
    logit = jnp.sum(h2 * w3_ref[...], axis=-1, keepdims=True) + b3_ref[...]
    o_ref[...] = logit


def mlp_discriminator(img, params):
    """img: (B, C, H, W) float32. Returns validity logits (B, 1) float32."""
    w1, b1, w2, b2, w3, b3 = params
    B = img.shape[0]

    # Same semantics as torch img.view(B, -1); stays f32 (cast happens in-kernel).
    x = img.reshape(B, -1)
    D = x.shape[1]

    TM = _pick_tm(B)
    grid = (pl.cdiv(B, TM),)

    # bf16 weights for the MXU; biases and the (1, 256) layer-3 row stay f32.
    w1b = w1.astype(jnp.bfloat16)
    w2b = w2.astype(jnp.bfloat16)
    w3r = w3.reshape(1, H2).astype(jnp.float32)   # (256,1) -> (1,256)
    b3r = b3.reshape(1, 1).astype(jnp.float32)

    out = pl.pallas_call(
        mlp_disc_kernel,
        out_shape=jax.ShapeDtypeStruct((B, 1), jnp.float32),
        grid=grid,
        in_specs=[
            pl.BlockSpec((TM, D), lambda i: (i, 0)),     # x tile (f32), pipelined over B
            pl.BlockSpec((D, H1), lambda i: (0, 0)),     # w1 bf16, resident
            pl.BlockSpec((1, H1), lambda i: (0, 0)),     # b1 f32
            pl.BlockSpec((H1, H2), lambda i: (0, 0)),    # w2 bf16, resident
            pl.BlockSpec((1, H2), lambda i: (0, 0)),     # b2 f32
            pl.BlockSpec((1, H2), lambda i: (0, 0)),     # w3 row f32
            pl.BlockSpec((1, 1), lambda i: (0, 0)),      # b3 f32
        ],
        out_specs=pl.BlockSpec((TM, 1), lambda i: (i, 0)),
        compiler_params=pltpu.CompilerParams(
            dimension_semantics=("parallel",),
            vmem_limit_bytes=32 * 1024 * 1024,
        ),
    )(x, w1b, b1, w2b, b2, w3r, b3r)

    return out


def init_params(key, in_dim):
    """Deterministic init. Weights stored as (in, out); biases as (1, out)."""
    ks = jax.random.split(key, 6)

    def linear(kw, kb, fan_in, fan_out):
        # Mirror PyTorch nn.Linear default init: U(-1/sqrt(fan_in), 1/sqrt(fan_in))
        bound = 1.0 / jnp.sqrt(jnp.float32(fan_in))
        w = jax.random.uniform(kw, (fan_in, fan_out), jnp.float32, -bound, bound)
        b = jax.random.uniform(kb, (1, fan_out), jnp.float32, -bound, bound)
        return w, b

    w1, b1 = linear(ks[0], ks[1], in_dim, H1)
    w2, b2 = linear(ks[2], ks[3], H1, H2)
    w3, b3 = linear(ks[4], ks[5], H2, 1)
    return (w1, b1, w2, b2, w3, b3)


if __name__ == "__main__":
    # Small config consistent with the module: opt.channels=4, opt.img_size=16
    B, C, H, W = 2, 4, 16, 16
    in_dim = C * H * W  # 1024

    key = jax.random.PRNGKey(0)
    k_img, k_params = jax.random.split(key)
    img = jax.random.normal(k_img, (B, C, H, W), jnp.float32)
    params = init_params(k_params, in_dim)

    validity = jax.jit(mlp_discriminator)(img, params)
    jax.block_until_ready(validity)

    # Reference in plain JAX with the same quantization scheme as the kernel:
    # bf16 x/w1/w2 and bf16 h1 on the MXU path (f32 accumulation), layer 3 f32.
    w1, b1, w2, b2, w3, b3 = params
    xq = img.reshape(B, -1).astype(jnp.bfloat16).astype(jnp.float32)
    w1q = w1.astype(jnp.bfloat16).astype(jnp.float32)
    w2q = w2.astype(jnp.bfloat16).astype(jnp.float32)

    h = xq @ w1q + b1
    h = jnp.where(h > 0, h, 0.2 * h)
    h = h.astype(jnp.bfloat16).astype(jnp.float32) @ w2q + b2
    h = jnp.where(h > 0, h, 0.2 * h)
    ref = h @ w3 + b3  # layer 3 in full f32, matching the kernel

    assert validity.shape == (B, 1)
    assert jnp.allclose(validity, ref, atol=2e-3, rtol=2e-3), (
        f"max abs diff {jnp.max(jnp.abs(validity - ref))}")

    print("KERNEL_OK")
</pallas_src>

<mosaic_0001>
module attributes {stable_mosaic.version = 11 : i64} {
  func.func @mlp_disc_kernel(%arg0: i32, %arg1: memref<16x1024xf32, #tpu.memory_space<vmem>>, %arg2: memref<1024x512xbf16, #tpu.memory_space<vmem>>, %arg3: memref<1x512xf32, #tpu.memory_space<vmem>>, %arg4: memref<512x256xbf16, #tpu.memory_space<vmem>>, %arg5: memref<1x256xf32, #tpu.memory_space<vmem>>, %arg6: memref<1x256xf32, #tpu.memory_space<vmem>>, %arg7: memref<1x1xf32, #tpu.memory_space<vmem>>, %arg8: memref<16x1xf32, #tpu.memory_space<vmem>>) attributes {dimension_semantics = [#tpu.dimension_semantics<parallel>], iteration_bounds = array<i64: 1>, scalar_prefetch = 0 : i64, scratch_operands = 0 : i64, tpu.core_type = #tpu.core_type<tc>, window_params = [{transform_indices = @transform_0, window_bounds = array<i64: 16, 1024>}, {pipeline_mode = #tpu.pipeline_mode<synchronous>, transform_indices = @transform_1, window_bounds = array<i64: 1024, 512>}, {pipeline_mode = #tpu.pipeline_mode<synchronous>, transform_indices = @transform_2, window_bounds = array<i64: 1, 512>}, {pipeline_mode = #tpu.pipeline_mode<synchronous>, transform_indices = @transform_3, window_bounds = array<i64: 512, 256>}, {pipeline_mode = #tpu.pipeline_mode<synchronous>, transform_indices = @transform_4, window_bounds = array<i64: 1, 256>}, {pipeline_mode = #tpu.pipeline_mode<synchronous>, transform_indices = @transform_5, window_bounds = array<i64: 1, 256>}, {pipeline_mode = #tpu.pipeline_mode<synchronous>, transform_indices = @transform_6, window_bounds = array<i64: 1, 1>}, {transform_indices = @transform_7, window_bounds = array<i64: 16, 1>}]} {
    %c0 = arith.constant 0 : index
    %c0_0 = arith.constant 0 : index
    %0 = vector.load %arg1[%c0, %c0_0] : memref<16x1024xf32, #tpu.memory_space<vmem>>, vector<16x1024xf32>
    %1 = arith.truncf %0 : vector<16x1024xf32> to vector<16x1024xbf16>
    %c0_1 = arith.constant 0 : index
    %c0_2 = arith.constant 0 : index
    %2 = vector.load %arg2[%c0_1, %c0_2] : memref<1024x512xbf16, #tpu.memory_space<vmem>>, vector<1024x512xbf16>
    %cst = arith.constant dense<0.000000e+00> : vector<16x512xf32>
    %3 = tpu.matmul %1, %2, %cst {dimension_numbers = #tpu.dot_dimension_numbers<[1], [0], [0], [1], [0, 0, 1, 1], [], []>} : vector<16x1024xbf16>, vector<1024x512xbf16>, vector<16x512xf32> -> vector<16x512xf32>
    %c0_3 = arith.constant 0 : index
    %c0_4 = arith.constant 0 : index
    %4 = vector.load %arg3[%c0_3, %c0_4] : memref<1x512xf32, #tpu.memory_space<vmem>>, vector<1x512xf32>
    %5 = vector.broadcast %4 : vector<1x512xf32> to vector<16x512xf32>
    %6 = arith.addf %3, %5 : vector<16x512xf32>
    %cst_5 = arith.constant 0.000000e+00 : f32
    %7 = vector.broadcast %cst_5 : f32 to vector<16x512xf32>
    %8 = arith.cmpf ogt, %6, %7 : vector<16x512xf32>
    %cst_6 = arith.constant 2.000000e-01 : f32
    %9 = vector.broadcast %cst_6 : f32 to vector<16x512xf32>
    %10 = arith.mulf %9, %6 : vector<16x512xf32>
    %11 = arith.select %8, %6, %10 : vector<16x512xi1>, vector<16x512xf32>
    %12 = arith.truncf %11 : vector<16x512xf32> to vector<16x512xbf16>
    %c0_7 = arith.constant 0 : index
    %c0_8 = arith.constant 0 : index
    %13 = vector.load %arg4[%c0_7, %c0_8] : memref<512x256xbf16, #tpu.memory_space<vmem>>, vector<512x256xbf16>
    %cst_9 = arith.constant dense<0.000000e+00> : vector<16x256xf32>
    %14 = tpu.matmul %12, %13, %cst_9 {dimension_numbers = #tpu.dot_dimension_numbers<[1], [0], [0], [1], [0, 0, 1, 1], [], []>} : vector<16x512xbf16>, vector<512x256xbf16>, vector<16x256xf32> -> vector<16x256xf32>
    %c0_10 = arith.constant 0 : index
    %c0_11 = arith.constant 0 : index
    %15 = vector.load %arg5[%c0_10, %c0_11] : memref<1x256xf32, #tpu.memory_space<vmem>>, vector<1x256xf32>
    %16 = vector.broadcast %15 : vector<1x256xf32> to vector<16x256xf32>
    %17 = arith.addf %14, %16 : vector<16x256xf32>
    %cst_12 = arith.constant 0.000000e+00 : f32
    %18 = vector.broadcast %cst_12 : f32 to vector<16x256xf32>
    %19 = arith.cmpf ogt, %17, %18 : vector<16x256xf32>
    %cst_13 = arith.constant 2.000000e-01 : f32
    %20 = vector.broadcast %cst_13 : f32 to vector<16x256xf32>
    %21 = arith.mulf %20, %17 : vector<16x256xf32>
    %22 = arith.select %19, %17, %21 : vector<16x256xi1>, vector<16x256xf32>
    %c0_14 = arith.constant 0 : index
    %c0_15 = arith.constant 0 : index
    %23 = vector.load %arg6[%c0_14, %c0_15] : memref<1x256xf32, #tpu.memory_space<vmem>>, vector<1x256xf32>
    %24 = vector.broadcast %23 : vector<1x256xf32> to vector<16x256xf32>
    %25 = arith.mulf %22, %24 : vector<16x256xf32>
    %cst_16 = arith.constant dense<0.000000e+00> : vector<16xf32>
    %26 = vector.multi_reduction <add>, %25, %cst_16 [1] : vector<16x256xf32> to vector<16xf32>
    %27 = vector.shape_cast %26 : vector<16xf32> to vector<16x1xf32>
    %c0_17 = arith.constant 0 : index
    %c0_18 = arith.constant 0 : index
    %28 = vector.load %arg7[%c0_17, %c0_18] : memref<1x1xf32, #tpu.memory_space<vmem>>, vector<1x1xf32>
    %29 = vector.broadcast %28 : vector<1x1xf32> to vector<16x1xf32>
    %30 = arith.addf %27, %29 : vector<16x1xf32>
    %c0_19 = arith.constant 0 : index
    %c0_20 = arith.constant 0 : index
    %31 = vector.load %arg8[%c0_19, %c0_20] : memref<16x1xf32, #tpu.memory_space<vmem>>, vector<16x1xf32>
    tpu.vector_store %arg8[%c0_19, %c0_20], %30 {strides = array<i32>} : memref<16x1xf32, #tpu.memory_space<vmem>>, vector<16x1xf32>,
    return
  }
  func.func @transform_0(%arg0: i32) -> (i32, i32) {
    %c0_i32 = arith.constant 0 : i32
    %c0_i32_0 = arith.constant 0 : i32
    return %arg0, %c0_i32 : i32, i32
  }
  func.func @transform_1(%arg0: i32) -> (i32, i32) {
    %c0_i32 = arith.constant 0 : i32
    %c0_i32_0 = arith.constant 0 : i32
    %c0_i32_1 = arith.constant 0 : i32
    return %c0_i32, %c0_i32_0 : i32, i32
  }
  func.func @transform_2(%arg0: i32) -> (i32, i32) {
    %c0_i32 = arith.constant 0 : i32
    %c0_i32_0 = arith.constant 0 : i32
    %c0_i32_1 = arith.constant 0 : i32
    return %c0_i32, %c0_i32_0 : i32, i32
  }
  func.func @transform_3(%arg0: i32) -> (i32, i32) {
    %c0_i32 = arith.constant 0 : i32
    %c0_i32_0 = arith.constant 0 : i32
    %c0_i32_1 = arith.constant 0 : i32
    return %c0_i32, %c0_i32_0 : i32, i32
  }
  func.func @transform_4(%arg0: i32) -> (i32, i32) {
    %c0_i32 = arith.constant 0 : i32
    %c0_i32_0 = arith.constant 0 : i32
    %c0_i32_1 = arith.constant 0 : i32
    return %c0_i32, %c0_i32_0 : i32, i32
  }
  func.func @transform_5(%arg0: i32) -> (i32, i32) {
    %c0_i32 = arith.constant 0 : i32
    %c0_i32_0 = arith.constant 0 : i32
    %c0_i32_1 = arith.constant 0 : i32
    return %c0_i32, %c0_i32_0 : i32, i32
  }
  func.func @transform_6(%arg0: i32) -> (i32, i32) {
    %c0_i32 = arith.constant 0 : i32
    %c0_i32_0 = arith.constant 0 : i32
    %c0_i32_1 = arith.constant 0 : i32
    return %c0_i32, %c0_i32_0 : i32, i32
  }
  func.func @transform_7(%arg0: i32) -> (i32, i32) {
    %c0_i32 = arith.constant 0 : i32
    %c0_i32_0 = arith.constant 0 : i32
    return %arg0, %c0_i32 : i32, i32
  }
}

</mosaic_0001>

<bundles_post_ra>
// kernel: mlp_discriminator.1
= control target key start
LH: loop header
LB: loop body
LE: loop exit
PB: predicated region body
PF: predicated region fallthrough
CT: control target
= control target key end

     0   :  { %s6469_s0 = inlined_call_operand.vmem [shape: f32[2,1024], index: 0, kind: input, shape index: {}]   ;;  %s6470_s1 = inlined_call_operand.vmem [shape: bf16[1024,512], index: 1, kind: input, shape index: {}]   ;;  %s6471_s2 = inlined_call_operand.vmem [shape: f32[1,512], index: 2, kind: input, shape index: {}]   ;;  %s6472_s3 = inlined_call_operand.vmem [shape: bf16[512,256], index: 3, kind: input, shape index: {}]   ;;  %s6473_s4 = inlined_call_operand.vmem [shape: f32[1,256], index: 4, kind: input, shape index: {}]   ;;  %s6474_s5 = inlined_call_operand.vmem [shape: f32[1,256], index: 5, kind: input, shape index: {}]   ;;  %s6475_s6 = inlined_call_operand.<no memory space> [shape: f32[1,1], index: 6, kind: input, shape index: {}]   ;;  %s6476_s7 = inlined_call_operand.vmem [shape: f32[2,1], index: 7, kind: output, shape index: {}]  }
   0x1   :  { %v12_v0 = vstv %s6475_s6 }
   0x2   :  { %13 = vst [vmem:[#allocation2] sm:$0x1] %v12_v0 }
   0x3   :  { %v2839_v1 = vld [vmem:[%s6470_s1 + $0xe0] sm:$0xf]  ;;  %v4035_v2 = vld [vmem:[%s6470_s1 + $0xec] sm:$0xf0]  ;;  %vm2681_vm12 = vcmask 7168  }
   0x4   :  { %v2967_v3 = vld [vmem:[%s6470_s1 + $0x1e0] sm:$0xf]  ;;  %v2840_v4 = vor.u32 %v4035_v2, %v2839_v1  ;;  %v4067_v5 = vld [vmem:[%s6470_s1 + $0x1ec] sm:$0xf0] }
   0x5   :  { %v3095_v6 = vld [vmem:[%s6470_s1 + $0x2e0] sm:$0xf]  ;;  %v4099_v7 = vld [vmem:[%s6470_s1 + $0x2ec] sm:$0xf0]  ;;  %v2968_v8 = vor.u32 %v4067_v5, %v2967_v3 }
   0x6   :  { %v3096_v9 = vor.u32 %v4099_v7, %v3095_v6  ;;  %v3223_v10 = vld [vmem:[%s6470_s1 + $0x3e0] sm:$0xf]  ;;  %v4131_v11 = vld [vmem:[%s6470_s1 + $0x3ec] sm:$0xf0]  ;;  %1669 = vmatpush.bf16.msra.mxu0 %v2840_v4 }
   0x7   :  { %v2823_v12 = vld [vmem:[%s6470_s1 + $0xc0] sm:$0xf]  ;;  %v3224_v13 = vor.u32 %v4131_v11, %v3223_v10  ;;  %v4031_v14 = vld [vmem:[%s6470_s1 + $0xcc] sm:$0xf0]  ;;  %1683 = vmatpush.bf16.msra.mxu1 %v2968_v8 }
   0x8   :  { %v2951_v15 = vld [vmem:[%s6470_s1 + $0x1c0] sm:$0xf]  ;;  %v4063_v16 = vld [vmem:[%s6470_s1 + $0x1cc] sm:$0xf0]  ;;  %1697 = vmatpush.bf16.msra.mxu2 %v3096_v9  ;;  %v2824_v17 = vor.u32 %v4031_v14, %v2823_v12 }
   0x9   :  { %v2952_v18 = vor.u32 %v4063_v16, %v2951_v15  ;;  %v3079_v19 = vld [vmem:[%s6470_s1 + $0x2c0] sm:$0xf]  ;;  %v4095_v20 = vld [vmem:[%s6470_s1 + $0x2cc] sm:$0xf0]  ;;  %1711 = vmatpush.bf16.msra.mxu3 %v3224_v13 }
   0xa   :  { %v3207_v21 = vld [vmem:[%s6470_s1 + $0x3c0] sm:$0xf]  ;;  %v3080_v22 = vor.u32 %v4095_v20, %v3079_v19  ;;  %v4127_v23 = vld [vmem:[%s6470_s1 + $0x3cc] sm:$0xf0]  ;;  %1670 = vmatpush.bf16.msra.mxu0 %v2824_v17 }
   0xb   :  { %v2807_v24 = vld [vmem:[%s6470_s1 + $0xa0] sm:$0xf]  ;;  %v4027_v25 = vld [vmem:[%s6470_s1 + $0xac] sm:$0xf0]  ;;  %v3208_v26 = vor.u32 %v4127_v23, %v3207_v21  ;;  %1684 = vmatpush.bf16.msra.mxu1 %v2952_v18 }
   0xc   :  { %v2935_v27 = vld [vmem:[%s6470_s1 + $0x1a0] sm:$0xf]  ;;  %v4059_v28 = vld [vmem:[%s6470_s1 + $0x1ac] sm:$0xf0]  ;;  %v2808_v30 = vor.u32 %v4027_v25, %v2807_v24  ;;  %1698 = vmatpush.bf16.msra.mxu2 %v3080_v22 }
   0xd   :  { %v3063_v29 = vld [vmem:[%s6470_s1 + $0x2a0] sm:$0xf]  ;;  %v4091_v31 = vld [vmem:[%s6470_s1 + $0x2ac] sm:$0xf0]  ;;  %v2936_v34 = vor.u32 %v4059_v28, %v2935_v27  ;;  %1712 = vmatpush.bf16.msra.mxu3 %v3208_v26 }
   0xe   :  { %v3191_v32 = vld [vmem:[%s6470_s1 + $0x3a0] sm:$0xf]  ;;  %v4123_v33 = vld [vmem:[%s6470_s1 + $0x3ac] sm:$0xf0]  ;;  %v3064_v35 = vor.u32 %v4091_v31, %v3063_v29  ;;  %1671 = vmatpush.bf16.msra.mxu0 %v2808_v30 }
   0xf   :  { %v2791_v36 = vld [vmem:[%s6470_s1 + $0x80] sm:$0xf]  ;;  %v4023_v37 = vld [vmem:[%s6470_s1 + $0x8c] sm:$0xf0]  ;;  %v3192_v39 = vor.u32 %v4123_v33, %v3191_v32  ;;  %1685 = vmatpush.bf16.msra.mxu1 %v2936_v34 }
  0x10   :  { %v2919_v38 = vld [vmem:[%s6470_s1 + $0x180] sm:$0xf]  ;;  %v4055_v40 = vld [vmem:[%s6470_s1 + $0x18c] sm:$0xf0]  ;;  %v2792_v45 = vor.u32 %v4023_v37, %v2791_v36  ;;  %1699 = vmatpush.bf16.msra.mxu2 %v3064_v35 }
  0x11   :  { %v3047_v41 = vld [vmem:[%s6470_s1 + $0x280] sm:$0xf]  ;;  %v4087_v42 = vld [vmem:[%s6470_s1 + $0x28c] sm:$0xf0]  ;;  %v2920_v46 = vor.u32 %v4055_v40, %v2919_v38  ;;  %1713 = vmatpush.bf16.msra.mxu3 %v3192_v39 }
  0x12   :  { %v3175_v43 = vld [vmem:[%s6470_s1 + $0x380] sm:$0xf]  ;;  %v4119_v44 = vld [vmem:[%s6470_s1 + $0x38c] sm:$0xf0]  ;;  %v3048_v47 = vor.u32 %v4087_v42, %v3047_v41  ;;  %1672 = vmatpush.bf16.msra.mxu0 %v2792_v45 }
  0x13   :  { %v2775_v48 = vld [vmem:[%s6470_s1 + $0x60] sm:$0xf]  ;;  %v4019_v49 = vld [vmem:[%s6470_s1 + $0x6c] sm:$0xf0]  ;;  %v3176_v51 = vor.u32 %v4119_v44, %v3175_v43  ;;  %1686 = vmatpush.bf16.msra.mxu1 %v2920_v46 }
  0x14   :  { %v2903_v50 = vld [vmem:[%s6470_s1 + $0x160] sm:$0xf]  ;;  %v4051_v52 = vld [vmem:[%s6470_s1 + $0x16c] sm:$0xf0]  ;;  %v2776_v57 = vor.u32 %v4019_v49, %v2775_v48  ;;  %1700 = vmatpush.bf16.msra.mxu2 %v3048_v47 }
  0x15   :  { %v3031_v53 = vld [vmem:[%s6470_s1 + $0x260] sm:$0xf]  ;;  %v4083_v54 = vld [vmem:[%s6470_s1 + $0x26c] sm:$0xf0]  ;;  %v2904_v58 = vor.u32 %v4051_v52, %v2903_v50  ;;  %1714 = vmatpush.bf16.msra.mxu3 %v3176_v51 }
  0x16   :  { %v3159_v55 = vld [vmem:[%s6470_s1 + $0x360] sm:$0xf]  ;;  %v4115_v56 = vld [vmem:[%s6470_s1 + $0x36c] sm:$0xf0]  ;;  %v3032_v59 = vor.u32 %v4083_v54, %v3031_v53  ;;  %1673 = vmatpush.bf16.msra.mxu0 %v2776_v57 }
  0x17   :  { %v2759_v60 = vld [vmem:[%s6470_s1 + $0x40] sm:$0xf]  ;;  %v4015_v61 = vld [vmem:[%s6470_s1 + $0x4c] sm:$0xf0]  ;;  %v3160_v63 = vor.u32 %v4115_v56, %v3159_v55  ;;  %1687 = vmatpush.bf16.msra.mxu1 %v2904_v58 }
  0x18   :  { %v2887_v62 = vld [vmem:[%s6470_s1 + $0x140] sm:$0xf]  ;;  %v4047_v0 = vld [vmem:[%s6470_s1 + $0x14c] sm:$0xf0]  ;;  %v2760_v5 = vor.u32 %v4015_v61, %v2759_v60  ;;  %1701 = vmatpush.bf16.msra.mxu2 %v3032_v59 }
  0x19   :  { %v3015_v1 = vld [vmem:[%s6470_s1 + $0x240] sm:$0xf]  ;;  %v4079_v2 = vld [vmem:[%s6470_s1 + $0x24c] sm:$0xf0]  ;;  %v2888_v6 = vor.u32 %v4047_v0, %v2887_v62  ;;  %1715 = vmatpush.bf16.msra.mxu3 %v3160_v63 }
  0x1a   :  { %v3143_v3 = vld [vmem:[%s6470_s1 + $0x340] sm:$0xf]  ;;  %v4111_v4 = vld [vmem:[%s6470_s1 + $0x34c] sm:$0xf0]  ;;  %v3016_v7 = vor.u32 %v4079_v2, %v3015_v1  ;;  %1674 = vmatpush.bf16.msra.mxu0 %v2760_v5 }
  0x1b   :  { %v2743_v8 = vld [vmem:[%s6470_s1 + $0x20] sm:$0xf]  ;;  %v4011_v9 = vld [vmem:[%s6470_s1 + $0x2c] sm:$0xf0]  ;;  %v3144_v11 = vor.u32 %v4111_v4, %v3143_v3  ;;  %1688 = vmatpush.bf16.msra.mxu1 %v2888_v6 }
  0x1c   :  { %v2871_v10 = vld [vmem:[%s6470_s1 + $0x120] sm:$0xf]  ;;  %v4043_v12 = vld [vmem:[%s6470_s1 + $0x12c] sm:$0xf0]  ;;  %v2744_v17 = vor.u32 %v4011_v9, %v2743_v8  ;;  %1702 = vmatpush.bf16.msra.mxu2 %v3016_v7 }
  0x1d   :  { %v2999_v13 = vld [vmem:[%s6470_s1 + $0x220] sm:$0xf]  ;;  %v4075_v14 = vld [vmem:[%s6470_s1 + $0x22c] sm:$0xf0]  ;;  %v2872_v20 = vor.u32 %v4043_v12, %v2871_v10  ;;  %1716 = vmatpush.bf16.msra.mxu3 %v3144_v11 }
  0x1e   :  { %v3127_v15 = vld [vmem:[%s6470_s1 + $0x320] sm:$0xf]  ;;  %v4107_v16 = vld [vmem:[%s6470_s1 + $0x32c] sm:$0xf0]  ;;  %v3000_v21 = vor.u32 %v4075_v14, %v2999_v13  ;;  %1675 = vmatpush.bf16.msra.mxu0 %v2744_v17 }
  0x1f   :  { %v2727_v18 = vld [vmem:[%s6470_s1] sm:$0xf]  ;;  %v4007_v19 = vld [vmem:[%s6470_s1 + $0xc] sm:$0xf0]  ;;  %v3128_v25 = vor.u32 %v4107_v16, %v3127_v15  ;;  %1689 = vmatpush.bf16.msra.mxu1 %v2872_v20 }
  0x20   :  { %v2855_v22 = vld [vmem:[%s6470_s1 + $0x100] sm:$0xf]  ;;  %v4039_v23 = vld [vmem:[%s6470_s1 + $0x10c] sm:$0xf0]  ;;  %v2728_v32 = vor.u32 %v4007_v19, %v2727_v18  ;;  %1703 = vmatpush.bf16.msra.mxu2 %v3000_v21 }
  0x21   :  { %v2983_v24 = vld [vmem:[%s6470_s1 + $0x200] sm:$0xf]  ;;  %v4071_v26 = vld [vmem:[%s6470_s1 + $0x20c] sm:$0xf0]  ;;  %v2856_v36 = vor.u32 %v4039_v23, %v2855_v22  ;;  %1717 = vmatpush.bf16.msra.mxu3 %v3128_v25 }
  0x22   :  { %v3111_v27 = vld [vmem:[%s6470_s1 + $0x300] sm:$0xf]  ;;  %v4103_v28 = vld [vmem:[%s6470_s1 + $0x30c] sm:$0xf0]  ;;  %v2984_v37 = vor.u32 %v4071_v26, %v2983_v24  ;;  %1676 = vmatpush.bf16.msra.mxu0 %v2728_v32 }
  0x23   :  { %v3351_v29 = vld [vmem:[%s6470_s1 + $0x4e0] sm:$0xf]  ;;  %v4163_v30 = vld [vmem:[%s6470_s1 + $0x4ec] sm:$0xf0]  ;;  %v3112_v40 = vor.u32 %v4103_v28, %v3111_v27  ;;  %1690 = vmatpush.bf16.msra.mxu1 %v2856_v36 }
  0x24   :  { %v3479_v31 = vld [vmem:[%s6470_s1 + $0x5e0] sm:$0xf]  ;;  %v4195_v33 = vld [vmem:[%s6470_s1 + $0x5ec] sm:$0xf0]  ;;  %v3352_v41 = vor.u32 %v4163_v30, %v3351_v29  ;;  %1704 = vmatpush.bf16.msra.mxu2 %v2984_v37 }
  0x25   :  { %v3607_v34 = vld [vmem:[%s6470_s1 + $0x6e0] sm:$0xf]  ;;  %v4227_v35 = vld [vmem:[%s6470_s1 + $0x6ec] sm:$0xf0]  ;;  %v3480_v44 = vor.u32 %v4195_v33, %v3479_v31  ;;  %1718 = vmatpush.bf16.msra.mxu3 %v3112_v40 }
  0x26   :  { %v3735_v38 = vld [vmem:[%s6470_s1 + $0x7e0] sm:$0xf]  ;;  %v4259_v39 = vld [vmem:[%s6470_s1 + $0x7ec] sm:$0xf0]  ;;  %v3608_v45 = vor.u32 %v4227_v35, %v3607_v34  ;;  %1725 = vmatpush.bf16.msrb.mxu0 %v3352_v41 }
  0x27   :  { %v3335_v42 = vld [vmem:[%s6470_s1 + $0x4c0] sm:$0xf]  ;;  %v4159_v43 = vld [vmem:[%s6470_s1 + $0x4cc] sm:$0xf0]  ;;  %v3736_v49 = vor.u32 %v4259_v39, %v3735_v38  ;;  %1739 = vmatpush.bf16.msrb.mxu1 %v3480_v44 }
  0x28   :  { %v3463_v46 = vld [vmem:[%s6470_s1 + $0x5c0] sm:$0xf]  ;;  %v4191_v47 = vld [vmem:[%s6470_s1 + $0x5cc] sm:$0xf0]  ;;  %v3336_v57 = vor.u32 %v4159_v43, %v3335_v42  ;;  %1753 = vmatpush.bf16.msrb.mxu2 %v3608_v45 }
  0x29   :  { %v3591_v48 = vld [vmem:[%s6470_s1 + $0x6c0] sm:$0xf]  ;;  %v4223_v50 = vld [vmem:[%s6470_s1 + $0x6cc] sm:$0xf0]  ;;  %v3464_v60 = vor.u32 %v4191_v47, %v3463_v46  ;;  %1767 = vmatpush.bf16.msrb.mxu3 %v3736_v49 }
  0x2a   :  { %v3719_v51 = vld [vmem:[%s6470_s1 + $0x7c0] sm:$0xf]  ;;  %v4255_v52 = vld [vmem:[%s6470_s1 + $0x7cc] sm:$0xf0]  ;;  %v3592_v61 = vor.u32 %v4223_v50, %v3591_v48  ;;  %1726 = vmatpush.bf16.msrb.mxu0 %v3336_v57 }
  0x2b   :  { %v3319_v53 = vld [vmem:[%s6470_s1 + $0x4a0] sm:$0xf]  ;;  %v30_v55 = vld [vmem:[%s6469_s0 + $0x10] sm:$0xff]  ;;  %v3720_v0 = vor.u32 %v4255_v52, %v3719_v51  ;;  %1740 = vmatpush.bf16.msrb.mxu1 %v3464_v60 }
  0x2c   :  { %v28_v54 = vld [vmem:[%s6469_s0] sm:$0xff]  ;;  %v4155_v58 = vld [vmem:[%s6470_s1 + $0x4ac] sm:$0xf0]  ;;  %62 = vst [vmem:[#allocation1 + $0x1] ss:$4 sm:$0xff] %v30_v55  ;;  %1754 = vmatpush.bf16.msrb.mxu2 %v3592_v61 }
  0x2d   :  { %v32_v56 = vld [vmem:[%s6469_s0 + $0x20] sm:$0xff]  ;;  %v34_v59 = vld [vmem:[%s6469_s0 + $0x30] sm:$0xff]  ;;  %60 = vst [vmem:[#allocation1] ss:$4 sm:$0xff] %v28_v54  ;;  %v3320_v5 = vor.u32 %v4155_v58, %v3319_v53  ;;  %1768 = vmatpush.bf16.msrb.mxu3 %v3720_v0 }
  0x2e   :  { %v3447_v62 = vld [vmem:[%s6470_s1 + $0x5a0] sm:$0xf]  ;;  %v4187_v63 = vld [vmem:[%s6470_s1 + $0x5ac] sm:$0xf0]  ;;  %64 = vst [vmem:[#allocation1 + $0x2] ss:$4 sm:$0xff] %v32_v56 }
  0x2f   :  { %v3575_v1 = vld [vmem:[%s6470_s1 + $0x6a0] sm:$0xf]  ;;  %v4219_v2 = vld [vmem:[%s6470_s1 + $0x6ac] sm:$0xf0]  ;;  %66 = vst [vmem:[#allocation1 + $0x3] ss:$4 sm:$0xff] %v34_v59  ;;  %v3448_v8 = vor.u32 %v4187_v63, %v3447_v62  ;;  %1727 = vmatpush.bf16.msrb.mxu0 %v3320_v5 }
  0x30   :  { %v3703_v3 = vld [vmem:[%s6470_s1 + $0x7a0] sm:$0xf]  ;;  %v4251_v4 = vld [vmem:[%s6470_s1 + $0x7ac] sm:$0xf0]  ;;  %v3576_v9 = vor.u32 %v4219_v2, %v3575_v1  ;;  %v29_v62 = vld [vmem:[%s6469_s0 + $0x8] sm:$0xff] }
  0x31   :  { %v3303_v6 = vld [vmem:[%s6470_s1 + $0x480] sm:$0xf]  ;;  %v4151_v7 = vld [vmem:[%s6470_s1 + $0x48c] sm:$0xf0]  ;;  %v3704_v13 = vor.u32 %v4251_v4, %v3703_v3  ;;  %1741 = vmatpush.bf16.msrb.mxu1 %v3448_v8  ;;  %v31_v63 = vld [vmem:[%s6469_s0 + $0x18] sm:$0xff] }
  0x32   :  { %v3431_v10 = vld [vmem:[%s6470_s1 + $0x580] sm:$0xf]  ;;  %v4183_v11 = vld [vmem:[%s6470_s1 + $0x58c] sm:$0xf0]  ;;  %v3304_v20 = vor.u32 %v4151_v7, %v3303_v6  ;;  %1755 = vmatpush.bf16.msrb.mxu2 %v3576_v9  ;;  %v4033_v2 = vld [vmem:[%s6470_s1 + $0xe4] sm:$0xf] }
  0x33   :  { %v3559_v12 = vld [vmem:[%s6470_s1 + $0x680] sm:$0xf]  ;;  %v4215_v14 = vld [vmem:[%s6470_s1 + $0x68c] sm:$0xf0]  ;;  %v3432_v25 = vor.u32 %v4183_v11, %v3431_v10  ;;  %1769 = vmatpush.bf16.msrb.mxu3 %v3704_v13  ;;  %68 = vst [vmem:[#allocation1 + $0x20] ss:$4 sm:$0xff] %v29_v62 }
  0x34   :  { %v3687_v15 = vld [vmem:[%s6470_s1 + $0x780] sm:$0xf]  ;;  %v4247_v16 = vld [vmem:[%s6470_s1 + $0x78c] sm:$0xf0]  ;;  %v3560_v26 = vor.u32 %v4215_v14, %v3559_v12  ;;  %1728 = vmatpush.bf16.msrb.mxu0 %v3304_v20  ;;  %v2841_v3 = vld [vmem:[%s6470_s1 + $0xf0] sm:$0xf0] }
  0x35   :  { %v36_v17 = vld [vmem:[%s6469_s0 + $0x40] sm:$0xff]  ;;  %v4147_v19 = vld [vmem:[%s6470_s1 + $0x46c] sm:$0xf0]  ;;  %v3688_v31 = vor.u32 %v4247_v16, %v3687_v15  ;;  %1742 = vmatpush.bf16.msrb.mxu1 %v3432_v25  ;;  %v33_v4 = vld [vmem:[%s6469_s0 + $0x28] sm:$0xff]  ;;  %70 = vst [vmem:[#allocation1 + $0x21] ss:$4 sm:$0xff] %v31_v63  ;;  %v2844_v25 = vor.u32 %v4033_v2, %v2841_v3 }
  0x36   :  { %v3287_v18 = vld [vmem:[%s6470_s1 + $0x460] sm:$0xf]  ;;  %v38_v21 = vld [vmem:[%s6469_s0 + $0x50] sm:$0xff]  ;;  %v4705_v34 = vld.sshfl [vmem:[#allocation1 + $0x8] sm:$0xff pattern:$0x73625140]  ;;  %1756 = vmatpush.bf16.msrb.mxu2 %v3560_v26 }
  0x37   :  { %v3415_v22 = vld [vmem:[%s6470_s1 + $0x560] sm:$0xf]  ;;  %v4179_v23 = vld [vmem:[%s6470_s1 + $0x56c] sm:$0xf0]  ;;  %v3288_v37 = vor.u32 %v4147_v19, %v3287_v18  ;;  %1770 = vmatpush.bf16.msrb.mxu3 %v3688_v31  ;;  %v35_v5 = vld [vmem:[%s6469_s0 + $0x38] sm:$0xff] }
  0x38   :  { %v3543_v24 = vld [vmem:[%s6470_s1 + $0x660] sm:$0xf]  ;;  %v4211_v28 = vld [vmem:[%s6470_s1 + $0x66c] sm:$0xf0]  ;;  %v3416_v40 = vor.u32 %v4179_v23, %v3415_v22  ;;  %72 = vst [vmem:[#allocation1 + $0x22] ss:$4 sm:$0xff] %v33_v4 }
  0x39   :  { %v40_v27 = vld [vmem:[%s6469_s0 + $0x60] sm:$0xff]  ;;  %v4243_v30 = vld [vmem:[%s6470_s1 + $0x76c] sm:$0xf0]  ;;  %v4707_v36 = vld.sshfl [vmem:[#allocation1 + $0x18] sm:$0xff pattern:$0x73625140]  ;;  %v3544_v41 = vor.u32 %v4211_v28, %v3543_v24  ;;  %1729 = vmatpush.bf16.msrb.mxu0 %v3288_v37 }
  0x3a   :  { %v3671_v29 = vld [vmem:[%s6470_s1 + $0x760] sm:$0xf]  ;;  %v42_v32 = vld [vmem:[%s6469_s0 + $0x70] sm:$0xff]  ;;  %1743 = vmatpush.bf16.msrb.mxu1 %v3416_v40  ;;  %v4065_v24 = vld [vmem:[%s6470_s1 + $0x1e4] sm:$0xf] }
  0x3b   :  { %v75_v33 = vld.sshfl [vmem:[#allocation1] sm:$0xff pattern:$0x73625140]  ;;  %v77_v35 = vld.sshfl [vmem:[#allocation1 + $0x10] sm:$0xff pattern:$0x73625140]  ;;  %v3672_v44 = vor.u32 %v4243_v30, %v3671_v29  ;;  %1757 = vmatpush.bf16.msrb.mxu2 %v3544_v41 }
  0x3c   :  { %83 = vst [vmem:[#allocation1] ss:$4 sm:$0xff] %v36_v17  ;;  %v3271_v38 = vld [vmem:[%s6470_s1 + $0x440] sm:$0xf]  ;;  %v4143_v39 = vld [vmem:[%s6470_s1 + $0x44c] sm:$0xf0] }
  0x3d   :  { %84 = vst [vmem:[#allocation1 + $0x1] ss:$4 sm:$0xff] %v38_v21  ;;  %v3399_v42 = vld [vmem:[%s6470_s1 + $0x540] sm:$0xf]  ;;  %v4175_v43 = vld [vmem:[%s6470_s1 + $0x54c] sm:$0xf0]  ;;  %v3272_v49 = vor.u32 %v4143_v39, %v3271_v38  ;;  %1771 = vmatpush.bf16.msrb.mxu3 %v3672_v44 }
  0x3e   :  { %85 = vst [vmem:[#allocation1 + $0x2] ss:$4 sm:$0xff] %v40_v27  ;;  %v3527_v45 = vld [vmem:[%s6470_s1 + $0x640] sm:$0xf]  ;;  %v4207_v46 = vld [vmem:[%s6470_s1 + $0x64c] sm:$0xf0]  ;;  %v3400_v51 = vor.u32 %v4175_v43, %v3399_v42 }
  0x3f   :  { %86 = vst [vmem:[#allocation1 + $0x3] ss:$4 sm:$0xff] %v42_v32  ;;  %v3655_v47 = vld [vmem:[%s6470_s1 + $0x740] sm:$0xf]  ;;  %v4239_v48 = vld [vmem:[%s6470_s1 + $0x74c] sm:$0xf0]  ;;  %v3528_v52 = vor.u32 %v4207_v46, %v3527_v45  ;;  %1730 = vmatpush.bf16.msrb.mxu0 %v3272_v49 }
  0x40   :  { %v3255_v50 = vld [vmem:[%s6470_s1 + $0x420] sm:$0xf]  ;;  %v4139_v53 = vld [vmem:[%s6470_s1 + $0x42c] sm:$0xf0]  ;;  %v3656_v56 = vor.u32 %v4239_v48, %v3655_v47  ;;  %1744 = vmatpush.bf16.msrb.mxu1 %v3400_v51  ;;  %v2969_v26 = vld [vmem:[%s6470_s1 + $0x1f0] sm:$0xf0] }
  0x41   :  { %v3383_v54 = vld [vmem:[%s6470_s1 + $0x520] sm:$0xf]  ;;  %v4171_v55 = vld [vmem:[%s6470_s1 + $0x52c] sm:$0xf0]  ;;  %v3256_v0 = vor.u32 %v4139_v53, %v3255_v50  ;;  %1758 = vmatpush.bf16.msrb.mxu2 %v3528_v52  ;;  %v4097_v27 = vld [vmem:[%s6470_s1 + $0x2e4] sm:$0xf] }
  0x42   :  { %v3511_v57 = vld [vmem:[%s6470_s1 + $0x620] sm:$0xf]  ;;  %v4203_v58 = vld [vmem:[%s6470_s1 + $0x62c] sm:$0xf0]  ;;  %1772 = vmatpush.bf16.msrb.mxu3 %v3656_v56  ;;  %v3384_v8 = vor.u32 %v4171_v55, %v3383_v54  ;;  %74 = vst [vmem:[#allocation1 + $0x23] ss:$4 sm:$0xff] %v35_v5 }
  0x43   :  { %v3639_v59 = vld [vmem:[%s6470_s1 + $0x720] sm:$0xf]  ;;  %v4235_v60 = vld [vmem:[%s6470_s1 + $0x72c] sm:$0xf0]  ;;  %v3512_v17 = vor.u32 %v4203_v58, %v3511_v57  ;;  %1731 = vmatpush.bf16.msrb.mxu0 %v3256_v0  ;;  %v3097_v28 = vld [vmem:[%s6470_s1 + $0x2f0] sm:$0xf0] }
  0x44   :  { %v3239_v61 = vld [vmem:[%s6470_s1 + $0x400] sm:$0xf]  ;;  %v4135_v1 = vld [vmem:[%s6470_s1 + $0x40c] sm:$0xf0]  ;;  %v3640_v18 = vor.u32 %v4235_v60, %v3639_v59  ;;  %v4129_v29 = vld [vmem:[%s6470_s1 + $0x3e4] sm:$0xf]  ;;  %1745 = vmatpush.bf16.msrb.mxu1 %v3384_v8  ;;  %v3100_v38 = vor.u32 %v4097_v27, %v3097_v28 }
  0x45   :  { %v3367_v9 = vld [vmem:[%s6470_s1 + $0x500] sm:$0xf]  ;;  %v4167_v10 = vld [vmem:[%s6470_s1 + $0x50c] sm:$0xf0]  ;;  %v3240_v22 = vor.u32 %v4135_v1, %v3239_v61  ;;  %v3225_v30 = vld [vmem:[%s6470_s1 + $0x3f0] sm:$0xf0]  ;;  %1759 = vmatpush.bf16.msrb.mxu2 %v3512_v17 }
  0x46   :  { %v91_v6 = vld.sshfl [vmem:[#allocation1] sm:$0xff pattern:$0x73625140]  ;;  %v93_v7 = vld.sshfl [vmem:[#allocation1 + $0x10] sm:$0xff pattern:$0x73625140]  ;;  %v3368_v31 = vor.u32 %v4167_v10, %v3367_v9  ;;  %1773 = vmatpush.bf16.msrb.mxu3 %v3640_v18  ;;  %v3228_v39 = vor.u32 %v4129_v29, %v3225_v30 }
  0x47   :  { %v3495_v11 = vld [vmem:[%s6470_s1 + $0x600] sm:$0xf]  ;;  %v4199_v12 = vld [vmem:[%s6470_s1 + $0x60c] sm:$0xf0]  ;;  %v4793_v13 = vpack.c.bf16 %v91_v6, %v75_v33  ;;  %v4795_v14 = vpack.c.bf16 %v93_v7, %v77_v35  ;;  %v4029_v33 = vld [vmem:[%s6470_s1 + $0xc4] sm:$0xf]  ;;  %1732 = vmatpush.bf16.msrb.mxu0 %v3240_v22 }
  0x48   :  { %v92_v15 = vld.sshfl [vmem:[#allocation1 + $0x8] sm:$0xff pattern:$0x73625140]  ;;  %v94_v16 = vld.sshfl [vmem:[#allocation1 + $0x18] sm:$0xff pattern:$0x73625140]  ;;  %v3496_v32 = vor.u32 %v4199_v12, %v3495_v11  ;;  %1746 = vmatpush.bf16.msrb.mxu1 %v3368_v31 }
  0x49   :  { %v3623_v19 = vld [vmem:[%s6470_s1 + $0x700] sm:$0xf]  ;;  %v4801_v20 = vpack.c.bf16 %v92_v15, %v4705_v34  ;;  %v4804_v21 = vpack.c.bf16 %v94_v16, %v4707_v36  ;;  %v4231_v23 = vld [vmem:[%s6470_s1 + $0x70c] sm:$0xf0]  ;;  %1677 = vmatmul.bf16.vlgmr.msra.gmra.mxu0 %v4793_v13  ;;  %1705 = vmatmul.bf16.vlgmr.msra.gmra.mxu2 %v4795_v14  ;;  %v2825_v34 = vld [vmem:[%s6470_s1 + $0xd0] sm:$0xf0]  ;;  %v2972_v36 = vor.u32 %v4065_v24, %v2969_v26 }
  0x4a   :  { %v3624_v35 = vor.u32 %v4231_v23, %v3623_v19  ;;  %v4061_v37 = vld [vmem:[%s6470_s1 + $0x1c4] sm:$0xf]  ;;  %v37_v40 = vld [vmem:[%s6469_s0 + $0x48] sm:$0xff]  ;;  %v2953_v41 = vld [vmem:[%s6470_s1 + $0x1d0] sm:$0xf0]  ;;  %v2828_v45 = vor.u32 %v4029_v33, %v2825_v34  ;;  %1760 = vmatpush.bf16.msrb.mxu2 %v3496_v32 }
  0x4b   :  { %1691 = vmatmul.bf16.vlgmr.msra.gmra.mxu1 %v4801_v20  ;;  %1719 = vmatmul.bf16.vlgmr.msra.gmra.mxu3 %v4804_v21  ;;  %v4093_v42 = vld [vmem:[%s6470_s1 + $0x2c4] sm:$0xf]  ;;  %v3081_v43 = vld [vmem:[%s6470_s1 + $0x2d0] sm:$0xf0]  ;;  %v39_v44 = vld [vmem:[%s6469_s0 + $0x58] sm:$0xff]  ;;  %v2956_v56 = vor.u32 %v4061_v37, %v2953_v41 }
  0x4c   :  { %1781 = vmatpush.bf16.msra.mxu0 %v2844_v25  ;;  %v4125_v46 = vld [vmem:[%s6470_s1 + $0x3c4] sm:$0xf]  ;;  %v3209_v47 = vld [vmem:[%s6470_s1 + $0x3d0] sm:$0xf0]  ;;  %v41_v49 = vld [vmem:[%s6469_s0 + $0x68] sm:$0xff]  ;;  %1774 = vmatpush.bf16.msrb.mxu3 %v3624_v35  ;;  %v3084_v61 = vor.u32 %v4093_v42, %v3081_v43 }
  0x4d   :  { %v4025_v48 = vld [vmem:[%s6470_s1 + $0xa4] sm:$0xf]  ;;  %v2809_v50 = vld [vmem:[%s6470_s1 + $0xb0] sm:$0xf0]  ;;  %1795 = vmatpush.bf16.msra.mxu1 %v2972_v36  ;;  %v43_v53 = vld [vmem:[%s6469_s0 + $0x78] sm:$0xff]  ;;  %v3212_v62 = vor.u32 %v4125_v46, %v3209_v47 }
  0x4e   :  { %v4057_v51 = vld [vmem:[%s6470_s1 + $0x1a4] sm:$0xf]  ;;  %v2937_v52 = vld [vmem:[%s6470_s1 + $0x1b0] sm:$0xf0]  ;;  %1809 = vmatpush.bf16.msra.mxu2 %v3100_v38  ;;  %v2812_v63 = vor.u32 %v4025_v48, %v2809_v50 }
  0x4f   :  { %v79_v54 = vld.sshfl [vmem:[#allocation1 + $0x20] sm:$0xff pattern:$0x73625140]  ;;  %v4879_v55 = vld.sshfl [vmem:[#allocation1 + $0x28] sm:$0xff pattern:$0x73625140]  ;;  %v2940_v4 = vor.u32 %v4057_v51, %v2937_v52 }
  0x50   :  { %v4089_v57 = vld [vmem:[%s6470_s1 + $0x2a4] sm:$0xf]  ;;  %v3065_v58 = vld [vmem:[%s6470_s1 + $0x2b0] sm:$0xf0]  ;;  %1823 = vmatpush.bf16.msra.mxu3 %v3228_v39  ;;  %1782 = vmatpush.bf16.msra.mxu0 %v2828_v45 }
  0x51   :  { %v81_v59 = vld.sshfl [vmem:[#allocation1 + $0x30] sm:$0xff pattern:$0x73625140]  ;;  %v82_v60 = vld.sshfl [vmem:[#allocation1 + $0x38] sm:$0xff pattern:$0x73625140]  ;;  %1796 = vmatpush.bf16.msra.mxu1 %v2956_v56  ;;  %v3068_v6 = vor.u32 %v4089_v57, %v3065_v58 }
  0x52   :  { %87 = vst [vmem:[#allocation1 + $0x20] ss:$4 sm:$0xff] %v37_v40  ;;  %v4121_v0 = vld [vmem:[%s6470_s1 + $0x3a4] sm:$0xf]  ;;  %v3193_v1 = vld [vmem:[%s6470_s1 + $0x3b0] sm:$0xf0]  ;;  %1810 = vmatpush.bf16.msra.mxu2 %v3084_v61 }
  0x53   :  { %88 = vst [vmem:[#allocation1 + $0x21] ss:$4 sm:$0xff] %v39_v44  ;;  %v4021_v2 = vld [vmem:[%s6470_s1 + $0x84] sm:$0xf]  ;;  %v2793_v3 = vld [vmem:[%s6470_s1 + $0x90] sm:$0xf0]  ;;  %v3196_v7 = vor.u32 %v4121_v0, %v3193_v1 }
  0x54   :  { %89 = vst [vmem:[#allocation1 + $0x22] ss:$4 sm:$0xff] %v41_v49  ;;  %v4053_v5 = vld [vmem:[%s6470_s1 + $0x184] sm:$0xf]  ;;  %1824 = vmatpush.bf16.msra.mxu3 %v3212_v62  ;;  %v2921_v8 = vld [vmem:[%s6470_s1 + $0x190] sm:$0xf0]  ;;  %1783 = vmatpush.bf16.msra.mxu0 %v2812_v63  ;;  %v2796_v10 = vor.u32 %v4021_v2, %v2793_v3 }
  0x55   :  { %90 = vst [vmem:[#allocation1 + $0x23] ss:$4 sm:$0xff] %v43_v53  ;;  %v4085_v9 = vld [vmem:[%s6470_s1 + $0x284] sm:$0xf]  ;;  %v3049_v11 = vld [vmem:[%s6470_s1 + $0x290] sm:$0xf0]  ;;  %1797 = vmatpush.bf16.msra.mxu1 %v2940_v4  ;;  %v2924_v18 = vor.u32 %v4053_v5, %v2921_v8 }
  0x56   :  { %v4117_v12 = vld [vmem:[%s6470_s1 + $0x384] sm:$0xf]  ;;  %v3177_v15 = vld [vmem:[%s6470_s1 + $0x390] sm:$0xf0]  ;;  %1811 = vmatpush.bf16.msra.mxu2 %v3068_v6  ;;  %v3052_v19 = vor.u32 %v4085_v9, %v3049_v11 }
  0x57   :  { %v4017_v16 = vld [vmem:[%s6470_s1 + $0x64] sm:$0xf]  ;;  %v2777_v17 = vld [vmem:[%s6470_s1 + $0x70] sm:$0xf0]  ;;  %v3180_v22 = vor.u32 %v4117_v12, %v3177_v15 }
  0x58   :  { %1825 = vmatpush.bf16.msra.mxu3 %v3196_v7  ;;  %v4049_v23 = vld [vmem:[%s6470_s1 + $0x164] sm:$0xf]  ;;  %v2905_v24 = vld [vmem:[%s6470_s1 + $0x170] sm:$0xf0]  ;;  %1784 = vmatpush.bf16.msra.mxu0 %v2796_v10  ;;  %v2780_v25 = vor.u32 %v4017_v16, %v2777_v17 }
  0x59   :  { %v4081_v26 = vld [vmem:[%s6470_s1 + $0x264] sm:$0xf]  ;;  %v3033_v27 = vld [vmem:[%s6470_s1 + $0x270] sm:$0xf0]  ;;  %1798 = vmatpush.bf16.msra.mxu1 %v2924_v18  ;;  %v2908_v34 = vor.u32 %v4049_v23, %v2905_v24 }
  0x5a   :  { %v4113_v28 = vld [vmem:[%s6470_s1 + $0x364] sm:$0xf]  ;;  %v3161_v29 = vld [vmem:[%s6470_s1 + $0x370] sm:$0xf0]  ;;  %1812 = vmatpush.bf16.msra.mxu2 %v3052_v19  ;;  %v3036_v41 = vor.u32 %v4081_v26, %v3033_v27 }
  0x5b   :  { %v4013_v30 = vld [vmem:[%s6470_s1 + $0x44] sm:$0xf]  ;;  %v2761_v31 = vld [vmem:[%s6470_s1 + $0x50] sm:$0xf0]  ;;  %v3164_v44 = vor.u32 %v4113_v28, %v3161_v29 }
  0x5c   :  { %v95_v32 = vld.sshfl [vmem:[#allocation1 + $0x20] sm:$0xff pattern:$0x73625140]  ;;  %v97_v33 = vld.sshfl [vmem:[#allocation1 + $0x30] sm:$0xff pattern:$0x73625140]  ;;  %1826 = vmatpush.bf16.msra.mxu3 %v3180_v22  ;;  %1785 = vmatpush.bf16.msra.mxu0 %v2780_v25  ;;  %v2764_v45 = vor.u32 %v4013_v30, %v2761_v31 }
  0x5d   :  { %v4045_v35 = vld [vmem:[%s6470_s1 + $0x144] sm:$0xf]  ;;  %v2889_v36 = vld [vmem:[%s6470_s1 + $0x150] sm:$0xf0]  ;;  %v4953_v37 = vpack.c.bf16 %v95_v32, %v79_v54  ;;  %v4955_v38 = vpack.c.bf16 %v97_v33, %v81_v59  ;;  %1799 = vmatpush.bf16.msra.mxu1 %v2908_v34 }
  0x5e   :  { %v96_v39 = vld.sshfl [vmem:[#allocation1 + $0x28] sm:$0xff pattern:$0x73625140]  ;;  %v98_v40 = vld.sshfl [vmem:[#allocation1 + $0x38] sm:$0xff pattern:$0x73625140]  ;;  %1813 = vmatpush.bf16.msra.mxu2 %v3036_v41  ;;  %v2892_v52 = vor.u32 %v4045_v35, %v2889_v36 }
  0x5f   :  { %v4958_v42 = vpack.c.bf16 %v96_v39, %v4879_v55  ;;  %v4960_v43 = vpack.c.bf16 %v98_v40, %v82_v60  ;;  %v4077_v46 = vld [vmem:[%s6470_s1 + $0x244] sm:$0xf]  ;;  %v3017_v47 = vld [vmem:[%s6470_s1 + $0x250] sm:$0xf0]  ;;  %1733 = vmatmul.bf16.vlgmr.msrb.gmra.mxu0 %v4953_v37  ;;  %1761 = vmatmul.bf16.vlgmr.msrb.gmra.mxu2 %v4955_v38 }
  0x60   :  { %v4109_v48 = vld [vmem:[%s6470_s1 + $0x344] sm:$0xf]  ;;  %v3145_v49 = vld [vmem:[%s6470_s1 + $0x350] sm:$0xf0]  ;;  %v3020_v53 = vor.u32 %v4077_v46, %v3017_v47  ;;  %1827 = vmatpush.bf16.msra.mxu3 %v3164_v44  ;;  %1786 = vmatpush.bf16.msra.mxu0 %v2764_v45 }
  0x61   :  { %v4009_v50 = vld [vmem:[%s6470_s1 + $0x24] sm:$0xf]  ;;  %v2745_v51 = vld [vmem:[%s6470_s1 + $0x30] sm:$0xf0]  ;;  %1747 = vmatmul.bf16.vlgmr.msrb.gmra.mxu1 %v4958_v42  ;;  %1775 = vmatmul.bf16.vlgmr.msrb.gmra.mxu3 %v4960_v43  ;;  %v3148_v56 = vor.u32 %v4109_v48, %v3145_v49 }
  0x62   :  { %v4041_v54 = vld [vmem:[%s6470_s1 + $0x124] sm:$0xf]  ;;  %v2873_v55 = vld [vmem:[%s6470_s1 + $0x130] sm:$0xf0]  ;;  %v2748_v57 = vor.u32 %v4009_v50, %v2745_v51  ;;  %1800 = vmatpush.bf16.msra.mxu1 %v2892_v52  ;;  %1814 = vmatpush.bf16.msra.mxu2 %v3020_v53 }
  0x63   :  { %v4073_v58 = vld [vmem:[%s6470_s1 + $0x224] sm:$0xf]  ;;  %v3001_v59 = vld [vmem:[%s6470_s1 + $0x230] sm:$0xf0]  ;;  %v2876_v2 = vor.u32 %v4041_v54, %v2873_v55 }
  0x64   :  { %v4105_v60 = vld [vmem:[%s6470_s1 + $0x324] sm:$0xf]  ;;  %v3129_v61 = vld [vmem:[%s6470_s1 + $0x330] sm:$0xf0]  ;;  %v3004_v3 = vor.u32 %v4073_v58, %v3001_v59  ;;  %1828 = vmatpush.bf16.msra.mxu3 %v3148_v56  ;;  %1787 = vmatpush.bf16.msra.mxu0 %v2748_v57 }
  0x65   :  { %v4005_v62 = vld [vmem:[%s6470_s1 + $0x4] sm:$0xf]  ;;  %v2729_v63 = vld [vmem:[%s6470_s1 + $0x10] sm:$0xf0]  ;;  %v3132_v7 = vor.u32 %v4105_v60, %v3129_v61 }
  0x66   :  { %v4161_v0 = vld [vmem:[%s6470_s1 + $0x4e4] sm:$0xf]  ;;  %v3353_v1 = vld [vmem:[%s6470_s1 + $0x4f0] sm:$0xf0]  ;;  %v2732_v8 = vor.u32 %v4005_v62, %v2729_v63  ;;  %1801 = vmatpush.bf16.msra.mxu1 %v2876_v2  ;;  %1815 = vmatpush.bf16.msra.mxu2 %v3004_v3 }
  0x67   :  { %v4037_v4 = vld [vmem:[%s6470_s1 + $0x104] sm:$0xf]  ;;  %v2857_v5 = vld [vmem:[%s6470_s1 + $0x110] sm:$0xf0]  ;;  %v3356_v12 = vor.u32 %v4161_v0, %v3353_v1 }
  0x68   :  { %v4069_v6 = vld [vmem:[%s6470_s1 + $0x204] sm:$0xf]  ;;  %v2985_v9 = vld [vmem:[%s6470_s1 + $0x210] sm:$0xf0]  ;;  %v2860_v23 = vor.u32 %v4037_v4, %v2857_v5  ;;  %1829 = vmatpush.bf16.msra.mxu3 %v3132_v7  ;;  %1788 = vmatpush.bf16.msra.mxu0 %v2732_v8 }
  0x69   :  { %v4101_v10 = vld [vmem:[%s6470_s1 + $0x304] sm:$0xf]  ;;  %v3113_v11 = vld [vmem:[%s6470_s1 + $0x310] sm:$0xf0]  ;;  %v2988_v24 = vor.u32 %v4069_v6, %v2985_v9 }
  0x6a   :  { %v4193_v15 = vld [vmem:[%s6470_s1 + $0x5e4] sm:$0xf]  ;;  %v3481_v16 = vld [vmem:[%s6470_s1 + $0x5f0] sm:$0xf0]  ;;  %v3116_v27 = vor.u32 %v4101_v10, %v3113_v11  ;;  %1802 = vmatpush.bf16.msra.mxu1 %v2860_v23 }
  0x6b   :  { %v4225_v17 = vld [vmem:[%s6470_s1 + $0x6e4] sm:$0xf]  ;;  %v3609_v18 = vld [vmem:[%s6470_s1 + $0x6f0] sm:$0xf0]  ;;  %v3484_v28 = vor.u32 %v4193_v15, %v3481_v16  ;;  %1816 = vmatpush.bf16.msra.mxu2 %v2988_v24 }
  0x6c   :  { %v4257_v19 = vld [vmem:[%s6470_s1 + $0x7e4] sm:$0xf]  ;;  %v3737_v22 = vld [vmem:[%s6470_s1 + $0x7f0] sm:$0xf0]  ;;  %1837 = vmatpush.bf16.msrb.mxu0 %v3356_v12  ;;  %v3612_v29 = vor.u32 %v4225_v17, %v3609_v18  ;;  %1830 = vmatpush.bf16.msra.mxu3 %v3116_v27 }
  0x6d   :  { %v4157_v25 = vld [vmem:[%s6470_s1 + $0x4c4] sm:$0xf]  ;;  %v3337_v26 = vld [vmem:[%s6470_s1 + $0x4d0] sm:$0xf0]  ;;  %v3740_v30 = vor.u32 %v4257_v19, %v3737_v22 }
  0x6e   :  { %v4189_v31 = vld [vmem:[%s6470_s1 + $0x5c4] sm:$0xf]  ;;  %v3465_v32 = vld [vmem:[%s6470_s1 + $0x5d0] sm:$0xf0]  ;;  %v3340_v34 = vor.u32 %v4157_v25, %v3337_v26  ;;  %1851 = vmatpush.bf16.msrb.mxu1 %v3484_v28 }
  0x6f   :  { %v4221_v33 = vld [vmem:[%s6470_s1 + $0x6c4] sm:$0xf]  ;;  %v3593_v35 = vld [vmem:[%s6470_s1 + $0x6d0] sm:$0xf0]  ;;  %v3468_v44 = vor.u32 %v4189_v31, %v3465_v32  ;;  %1865 = vmatpush.bf16.msrb.mxu2 %v3612_v29  ;;  %1789 = vmatmul.bf16.vlgmr.msra.gmra.mxu0 %v4793_v13 }
  0x70   :  { %v4253_v36 = vld [vmem:[%s6470_s1 + $0x7c4] sm:$0xf]  ;;  %v3721_v39 = vld [vmem:[%s6470_s1 + $0x7d0] sm:$0xf0]  ;;  %1879 = vmatpush.bf16.msrb.mxu3 %v3740_v30  ;;  %v3596_v45 = vor.u32 %v4221_v33, %v3593_v35  ;;  %1838 = vmatpush.bf16.msrb.mxu0 %v3340_v34 }
  0x71   :  { %v4153_v40 = vld [vmem:[%s6470_s1 + $0x4a4] sm:$0xf]  ;;  %v3321_v41 = vld [vmem:[%s6470_s1 + $0x4b0] sm:$0xf0]  ;;  %v3724_v46 = vor.u32 %v4253_v36, %v3721_v39  ;;  %1817 = vmatmul.bf16.vlgmr.msra.gmra.mxu2 %v4795_v14  ;;  %1803 = vmatmul.bf16.vlgmr.msra.gmra.mxu1 %v4801_v20 }
  0x72   :  { %v4185_v47 = vld [vmem:[%s6470_s1 + $0x5a4] sm:$0xf]  ;;  %v3449_v48 = vld [vmem:[%s6470_s1 + $0x5b0] sm:$0xf0]  ;;  %v3324_v50 = vor.u32 %v4153_v40, %v3321_v41  ;;  %1852 = vmatpush.bf16.msrb.mxu1 %v3468_v44  ;;  %1831 = vmatmul.bf16.vlgmr.msra.gmra.mxu3 %v4804_v21 }
  0x73   :  { %v4217_v49 = vld [vmem:[%s6470_s1 + $0x6a4] sm:$0xf]  ;;  %v3577_v51 = vld [vmem:[%s6470_s1 + $0x6b0] sm:$0xf0]  ;;  %v3452_v56 = vor.u32 %v4185_v47, %v3449_v48  ;;  %1866 = vmatpush.bf16.msrb.mxu2 %v3596_v45 }
  0x74   :  { %v4249_v52 = vld [vmem:[%s6470_s1 + $0x7a4] sm:$0xf]  ;;  %v3705_v53 = vld [vmem:[%s6470_s1 + $0x7b0] sm:$0xf0]  ;;  %1880 = vmatpush.bf16.msrb.mxu3 %v3724_v46  ;;  %v3580_v57 = vor.u32 %v4217_v49, %v3577_v51  ;;  %1839 = vmatpush.bf16.msrb.mxu0 %v3324_v50  ;;  %v2847_v50 = vld [vmem:[%s6470_s1 + $0xe8] sm:$0xf] }
  0x75   :  { %v4149_v54 = vld [vmem:[%s6470_s1 + $0x484] sm:$0xf]  ;;  %v3305_v55 = vld [vmem:[%s6470_s1 + $0x490] sm:$0xf0]  ;;  %v3708_v58 = vor.u32 %v4249_v52, %v3705_v53  ;;  %v4036_v51 = vld [vmem:[%s6470_s1 + $0xf4] sm:$0xf0] }
  0x76   :  { %v4181_v59 = vld [vmem:[%s6470_s1 + $0x584] sm:$0xf]  ;;  %v3433_v60 = vld [vmem:[%s6470_s1 + $0x590] sm:$0xf0]  ;;  %v3308_v62 = vor.u32 %v4149_v54, %v3305_v55  ;;  %1853 = vmatpush.bf16.msrb.mxu1 %v3452_v56 }
  0x77   :  { %v4213_v61 = vld [vmem:[%s6470_s1 + $0x684] sm:$0xf]  ;;  %v3561_v63 = vld [vmem:[%s6470_s1 + $0x690] sm:$0xf0]  ;;  %v3436_v4 = vor.u32 %v4181_v59, %v3433_v60  ;;  %1867 = vmatpush.bf16.msrb.mxu2 %v3580_v57  ;;  %v2975_v60 = vld [vmem:[%s6470_s1 + $0x1e8] sm:$0xf] }
  0x78   :  { %v4245_v0 = vld [vmem:[%s6470_s1 + $0x784] sm:$0xf]  ;;  %v3689_v1 = vld [vmem:[%s6470_s1 + $0x790] sm:$0xf0]  ;;  %1881 = vmatpush.bf16.msrb.mxu3 %v3708_v58  ;;  %v3564_v5 = vor.u32 %v4213_v61, %v3561_v63  ;;  %1840 = vmatpush.bf16.msrb.mxu0 %v3308_v62  ;;  %v2848_v61 = vor.u32 %v4036_v51, %v2847_v50  ;;  %v4068_v62 = vld [vmem:[%s6470_s1 + $0x1f4] sm:$0xf0] }
  0x79   :  { %v4145_v2 = vld [vmem:[%s6470_s1 + $0x464] sm:$0xf]  ;;  %v3289_v3 = vld [vmem:[%s6470_s1 + $0x470] sm:$0xf0]  ;;  %v3692_v6 = vor.u32 %v4245_v0, %v3689_v1  ;;  %v3103_v63 = vld [vmem:[%s6470_s1 + $0x2e8] sm:$0xf] }
  0x7a   :  { %v4177_v7 = vld [vmem:[%s6470_s1 + $0x564] sm:$0xf]  ;;  %v3417_v8 = vld [vmem:[%s6470_s1 + $0x570] sm:$0xf0]  ;;  %v3292_v10 = vor.u32 %v4145_v2, %v3289_v3  ;;  %1854 = vmatpush.bf16.msrb.mxu1 %v3436_v4  ;;  %v4100_v0 = vld [vmem:[%s6470_s1 + $0x2f4] sm:$0xf0] }
  0x7b   :  { %v4209_v9 = vld [vmem:[%s6470_s1 + $0x664] sm:$0xf]  ;;  %v3545_v11 = vld [vmem:[%s6470_s1 + $0x670] sm:$0xf0]  ;;  %v3420_v18 = vor.u32 %v4177_v7, %v3417_v8  ;;  %1868 = vmatpush.bf16.msrb.mxu2 %v3564_v5  ;;  %v3231_v2 = vld [vmem:[%s6470_s1 + $0x3e8] sm:$0xf]  ;;  %v3104_v7 = vor.u32 %v4100_v0, %v3103_v63 }
  0x7c   :  { %v4241_v12 = vld [vmem:[%s6470_s1 + $0x764] sm:$0xf]  ;;  %v3673_v15 = vld [vmem:[%s6470_s1 + $0x770] sm:$0xf0]  ;;  %1882 = vmatpush.bf16.msrb.mxu3 %v3692_v6  ;;  %v3548_v19 = vor.u32 %v4209_v9, %v3545_v11  ;;  %1841 = vmatpush.bf16.msrb.mxu0 %v3292_v10  ;;  %v4132_v3 = vld [vmem:[%s6470_s1 + $0x3f4] sm:$0xf0]  ;;  %v2976_v6 = vor.u32 %v4068_v62, %v2975_v60 }
  0x7d   :  { %v4141_v16 = vld [vmem:[%s6470_s1 + $0x444] sm:$0xf]  ;;  %v3273_v17 = vld [vmem:[%s6470_s1 + $0x450] sm:$0xf0]  ;;  %v3676_v22 = vor.u32 %v4241_v12, %v3673_v15  ;;  %v2831_v8 = vld [vmem:[%s6470_s1 + $0xc8] sm:$0xf]  ;;  %v3232_v11 = vor.u32 %v4132_v3, %v3231_v2 }
  0x7e   :  { %v4173_v23 = vld [vmem:[%s6470_s1 + $0x544] sm:$0xf]  ;;  %v3401_v24 = vld [vmem:[%s6470_s1 + $0x550] sm:$0xf0]  ;;  %v3276_v26 = vor.u32 %v4141_v16, %v3273_v17  ;;  %1855 = vmatpush.bf16.msrb.mxu1 %v3420_v18  ;;  %v4032_v9 = vld [vmem:[%s6470_s1 + $0xd4] sm:$0xf0] }
  0x7f   :  { %v4205_v25 = vld [vmem:[%s6470_s1 + $0x644] sm:$0xf]  ;;  %v3529_v27 = vld [vmem:[%s6470_s1 + $0x650] sm:$0xf0]  ;;  %v3404_v32 = vor.u32 %v4173_v23, %v3401_v24  ;;  %1869 = vmatpush.bf16.msrb.mxu2 %v3548_v19  ;;  %v2959_v10 = vld [vmem:[%s6470_s1 + $0x1c8] sm:$0xf]  ;;  %v2832_v19 = vor.u32 %v4032_v9, %v2831_v8 }
  0x80   :  { %v4237_v28 = vld [vmem:[%s6470_s1 + $0x744] sm:$0xf]  ;;  %v3657_v29 = vld [vmem:[%s6470_s1 + $0x750] sm:$0xf0]  ;;  %1883 = vmatpush.bf16.msrb.mxu3 %v3676_v22  ;;  %v3532_v33 = vor.u32 %v4205_v25, %v3529_v27  ;;  %1842 = vmatpush.bf16.msrb.mxu0 %v3276_v26  ;;  %v4064_v12 = vld [vmem:[%s6470_s1 + $0x1d4] sm:$0xf0] }
  0x81   :  { %v4137_v30 = vld [vmem:[%s6470_s1 + $0x424] sm:$0xf]  ;;  %v3257_v31 = vld [vmem:[%s6470_s1 + $0x430] sm:$0xf0]  ;;  %v3660_v34 = vor.u32 %v4237_v28, %v3657_v29  ;;  %v3087_v15 = vld [vmem:[%s6470_s1 + $0x2c8] sm:$0xf]  ;;  %v2960_v22 = vor.u32 %v4064_v12, %v2959_v10 }
  0x82   :  { %v4169_v35 = vld [vmem:[%s6470_s1 + $0x524] sm:$0xf]  ;;  %v3385_v36 = vld [vmem:[%s6470_s1 + $0x530] sm:$0xf0]  ;;  %v3260_v40 = vor.u32 %v4137_v30, %v3257_v31  ;;  %1856 = vmatpush.bf16.msrb.mxu1 %v3404_v32  ;;  %v4096_v16 = vld [vmem:[%s6470_s1 + $0x2d4] sm:$0xf0] }
  0x83   :  { %v4201_v39 = vld [vmem:[%s6470_s1 + $0x624] sm:$0xf]  ;;  %v3513_v41 = vld [vmem:[%s6470_s1 + $0x630] sm:$0xf0]  ;;  %v3388_v48 = vor.u32 %v4169_v35, %v3385_v36  ;;  %1870 = vmatpush.bf16.msrb.mxu2 %v3532_v33  ;;  %v3215_v17 = vld [vmem:[%s6470_s1 + $0x3c8] sm:$0xf]  ;;  %v3088_v23 = vor.u32 %v4096_v16, %v3087_v15 }
  0x84   :  { %v4233_v44 = vld [vmem:[%s6470_s1 + $0x724] sm:$0xf]  ;;  %v3641_v45 = vld [vmem:[%s6470_s1 + $0x730] sm:$0xf0]  ;;  %1884 = vmatpush.bf16.msrb.mxu3 %v3660_v34  ;;  %v3516_v52 = vor.u32 %v4201_v39, %v3513_v41  ;;  %1843 = vmatpush.bf16.msrb.mxu0 %v3260_v40  ;;  %v4128_v18 = vld [vmem:[%s6470_s1 + $0x3d4] sm:$0xf0] }
  0x85   :  { %v4133_v46 = vld [vmem:[%s6470_s1 + $0x404] sm:$0xf]  ;;  %v3241_v47 = vld [vmem:[%s6470_s1 + $0x410] sm:$0xf0]  ;;  %v3644_v53 = vor.u32 %v4233_v44, %v3641_v45  ;;  %v2815_v24 = vld [vmem:[%s6470_s1 + $0xa8] sm:$0xf]  ;;  %v3216_v27 = vor.u32 %v4128_v18, %v3215_v17 }
  0x86   :  { %v4165_v49 = vld [vmem:[%s6470_s1 + $0x504] sm:$0xf]  ;;  %v3369_v54 = vld [vmem:[%s6470_s1 + $0x510] sm:$0xf0]  ;;  %v3244_v57 = vor.u32 %v4133_v46, %v3241_v47  ;;  %1857 = vmatpush.bf16.msrb.mxu1 %v3388_v48  ;;  %v4028_v25 = vld [vmem:[%s6470_s1 + $0xb4] sm:$0xf0] }
  0x87   :  { %v4197_v55 = vld [vmem:[%s6470_s1 + $0x604] sm:$0xf]  ;;  %v3497_v56 = vld [vmem:[%s6470_s1 + $0x610] sm:$0xf0]  ;;  %v3372_v1 = vor.u32 %v4165_v49, %v3369_v54  ;;  %1871 = vmatpush.bf16.msrb.mxu2 %v3516_v52  ;;  %v2943_v26 = vld [vmem:[%s6470_s1 + $0x1a8] sm:$0xf]  ;;  %v2816_v33 = vor.u32 %v4028_v25, %v2815_v24 }
  0x88   :  { %v4229_v58 = vld [vmem:[%s6470_s1 + $0x704] sm:$0xf]  ;;  %v3625_v59 = vld [vmem:[%s6470_s1 + $0x710] sm:$0xf0]  ;;  %1885 = vmatpush.bf16.msrb.mxu3 %v3644_v53  ;;  %v3500_v4 = vor.u32 %v4197_v55, %v3497_v56  ;;  %1844 = vmatpush.bf16.msrb.mxu0 %v3244_v57  ;;  %v4060_v28 = vld [vmem:[%s6470_s1 + $0x1b4] sm:$0xf0] }
  0x89   :  { %v3628_v5 = vor.u32 %v4229_v58, %v3625_v59  ;;  %v3071_v29 = vld [vmem:[%s6470_s1 + $0x2a8] sm:$0xf]  ;;  %v4092_v30 = vld [vmem:[%s6470_s1 + $0x2b4] sm:$0xf0]  ;;  %v2944_v35 = vor.u32 %v4060_v28, %v2943_v26 }
  0x8a   :  { %1858 = vmatpush.bf16.msrb.mxu1 %v3372_v1  ;;  %v3199_v31 = vld [vmem:[%s6470_s1 + $0x3a8] sm:$0xf]  ;;  %v4124_v32 = vld [vmem:[%s6470_s1 + $0x3b4] sm:$0xf0]  ;;  %v3072_v36 = vor.u32 %v4092_v30, %v3071_v29 }
  0x8b   :  { %1872 = vmatpush.bf16.msrb.mxu2 %v3500_v4  ;;  %1845 = vmatmul.bf16.vlgmr.msrb.gmra.mxu0 %v4953_v37  ;;  %v2799_v34 = vld [vmem:[%s6470_s1 + $0x88] sm:$0xf]  ;;  %v4024_v39 = vld [vmem:[%s6470_s1 + $0x94] sm:$0xf0]  ;;  %v3200_v44 = vor.u32 %v4124_v32, %v3199_v31 }
  0x8c   :  { %1893 = vmatpush.bf16.msra.mxu0 %v2848_v61  ;;  %1886 = vmatpush.bf16.msrb.mxu3 %v3628_v5  ;;  %v2927_v40 = vld [vmem:[%s6470_s1 + $0x188] sm:$0xf]  ;;  %v4056_v41 = vld [vmem:[%s6470_s1 + $0x194] sm:$0xf0]  ;;  %v2800_v49 = vor.u32 %v4024_v39, %v2799_v34 }
  0x8d   :  { %1859 = vmatmul.bf16.vlgmr.msrb.gmra.mxu1 %v4958_v42  ;;  %v3055_v45 = vld [vmem:[%s6470_s1 + $0x288] sm:$0xf]  ;;  %v4088_v46 = vld [vmem:[%s6470_s1 + $0x294] sm:$0xf0]  ;;  %v2928_v50 = vor.u32 %v4056_v41, %v2927_v40 }
  0x8e   :  { %1907 = vmatpush.bf16.msra.mxu1 %v2976_v6  ;;  %1873 = vmatmul.bf16.vlgmr.msrb.gmra.mxu2 %v4955_v38  ;;  %v3183_v47 = vld [vmem:[%s6470_s1 + $0x388] sm:$0xf]  ;;  %v4120_v48 = vld [vmem:[%s6470_s1 + $0x394] sm:$0xf0]  ;;  %v3056_v51 = vor.u32 %v4088_v46, %v3055_v45 }
  0x8f   :  { %1921 = vmatpush.bf16.msra.mxu2 %v3104_v7  ;;  %1887 = vmatmul.bf16.vlgmr.msrb.gmra.mxu3 %v4960_v43  ;;  %v2783_v52 = vld [vmem:[%s6470_s1 + $0x68] sm:$0xf]  ;;  %v4020_v53 = vld [vmem:[%s6470_s1 + $0x74] sm:$0xf0]  ;;  %v3184_v55 = vor.u32 %v4120_v48, %v3183_v47 }
  0x90   :  { %1935 = vmatpush.bf16.msra.mxu3 %v3232_v11  ;;  %1894 = vmatpush.bf16.msra.mxu0 %v2832_v19  ;;  %v2911_v54 = vld [vmem:[%s6470_s1 + $0x168] sm:$0xf]  ;;  %v4052_v56 = vld [vmem:[%s6470_s1 + $0x174] sm:$0xf0]  ;;  %v2784_v61 = vor.u32 %v4020_v53, %v2783_v52 }
  0x91   :  { %v3039_v57 = vld [vmem:[%s6470_s1 + $0x268] sm:$0xf]  ;;  %v4084_v58 = vld [vmem:[%s6470_s1 + $0x274] sm:$0xf0]  ;;  %v2912_v62 = vor.u32 %v4052_v56, %v2911_v54 }
  0x92   :  { %1908 = vmatpush.bf16.msra.mxu1 %v2960_v22  ;;  %v3167_v59 = vld [vmem:[%s6470_s1 + $0x368] sm:$0xf]  ;;  %v4116_v60 = vld [vmem:[%s6470_s1 + $0x374] sm:$0xf0]  ;;  %v3040_v63 = vor.u32 %v4084_v58, %v3039_v57 }
  0x93   :  { %1922 = vmatpush.bf16.msra.mxu2 %v3088_v23  ;;  %v2767_v0 = vld [vmem:[%s6470_s1 + $0x48] sm:$0xf]  ;;  %v4016_v1 = vld [vmem:[%s6470_s1 + $0x54] sm:$0xf0]  ;;  %v3168_v3 = vor.u32 %v4116_v60, %v3167_v59 }
  0x94   :  { %1936 = vmatpush.bf16.msra.mxu3 %v3216_v27  ;;  %1895 = vmatpush.bf16.msra.mxu0 %v2816_v33  ;;  %v2895_v2 = vld [vmem:[%s6470_s1 + $0x148] sm:$0xf]  ;;  %v4048_v4 = vld [vmem:[%s6470_s1 + $0x154] sm:$0xf0]  ;;  %v2768_v9 = vor.u32 %v4016_v1, %v2767_v0 }
  0x95   :  { %v3023_v5 = vld [vmem:[%s6470_s1 + $0x248] sm:$0xf]  ;;  %v4080_v6 = vld [vmem:[%s6470_s1 + $0x254] sm:$0xf0]  ;;  %v2896_v10 = vor.u32 %v4048_v4, %v2895_v2 }
  0x96   :  { %1909 = vmatpush.bf16.msra.mxu1 %v2944_v35  ;;  %v3151_v7 = vld [vmem:[%s6470_s1 + $0x348] sm:$0xf]  ;;  %v4112_v8 = vld [vmem:[%s6470_s1 + $0x354] sm:$0xf0]  ;;  %v3024_v11 = vor.u32 %v4080_v6, %v3023_v5 }
  0x97   :  { %1923 = vmatpush.bf16.msra.mxu2 %v3072_v36  ;;  %v2751_v12 = vld [vmem:[%s6470_s1 + $0x28] sm:$0xf]  ;;  %v4012_v15 = vld [vmem:[%s6470_s1 + $0x34] sm:$0xf0]  ;;  %v3152_v17 = vor.u32 %v4112_v8, %v3151_v7 }
  0x98   :  { %1937 = vmatpush.bf16.msra.mxu3 %v3200_v44  ;;  %1896 = vmatpush.bf16.msra.mxu0 %v2800_v49  ;;  %v2879_v16 = vld [vmem:[%s6470_s1 + $0x128] sm:$0xf]  ;;  %v4044_v18 = vld [vmem:[%s6470_s1 + $0x134] sm:$0xf0]  ;;  %v2752_v25 = vor.u32 %v4012_v15, %v2751_v12 }
  0x99   :  { %v3007_v19 = vld [vmem:[%s6470_s1 + $0x228] sm:$0xf]  ;;  %v4076_v22 = vld [vmem:[%s6470_s1 + $0x234] sm:$0xf0]  ;;  %v2880_v28 = vor.u32 %v4044_v18, %v2879_v16 }
  0x9a   :  { %1910 = vmatpush.bf16.msra.mxu1 %v2928_v50  ;;  %v3135_v23 = vld [vmem:[%s6470_s1 + $0x328] sm:$0xf]  ;;  %v4108_v24 = vld [vmem:[%s6470_s1 + $0x334] sm:$0xf0]  ;;  %v3008_v29 = vor.u32 %v4076_v22, %v3007_v19 }
  0x9b   :  { %1924 = vmatpush.bf16.msra.mxu2 %v3056_v51  ;;  %v2735_v26 = vld [vmem:[%s6470_s1 + $0x8] sm:$0xf]  ;;  %v4008_v27 = vld [vmem:[%s6470_s1 + $0x14] sm:$0xf0]  ;;  %v3136_v33 = vor.u32 %v4108_v24, %v3135_v23 }
  0x9c   :  { %1938 = vmatpush.bf16.msra.mxu3 %v3184_v55  ;;  %1897 = vmatpush.bf16.msra.mxu0 %v2784_v61  ;;  %v2863_v30 = vld [vmem:[%s6470_s1 + $0x108] sm:$0xf]  ;;  %v4040_v31 = vld [vmem:[%s6470_s1 + $0x114] sm:$0xf0]  ;;  %v2736_v44 = vor.u32 %v4008_v27, %v2735_v26 }
  0x9d   :  { %v2991_v32 = vld [vmem:[%s6470_s1 + $0x208] sm:$0xf]  ;;  %v4072_v34 = vld [vmem:[%s6470_s1 + $0x214] sm:$0xf0]  ;;  %v2864_v48 = vor.u32 %v4040_v31, %v2863_v30 }
  0x9e   :  { %1911 = vmatpush.bf16.msra.mxu1 %v2912_v62  ;;  %v3119_v35 = vld [vmem:[%s6470_s1 + $0x308] sm:$0xf]  ;;  %v4104_v36 = vld [vmem:[%s6470_s1 + $0x314] sm:$0xf0]  ;;  %v2992_v49 = vor.u32 %v4072_v34, %v2991_v32 }
  0x9f   :  { %1925 = vmatpush.bf16.msra.mxu2 %v3040_v63  ;;  %v3359_v39 = vld [vmem:[%s6470_s1 + $0x4e8] sm:$0xf]  ;;  %v4164_v40 = vld [vmem:[%s6470_s1 + $0x4f4] sm:$0xf0]  ;;  %v3120_v52 = vor.u32 %v4104_v36, %v3119_v35 }
  0xa0   :  { %1939 = vmatpush.bf16.msra.mxu3 %v3168_v3  ;;  %1898 = vmatpush.bf16.msra.mxu0 %v2768_v9  ;;  %v3487_v41 = vld [vmem:[%s6470_s1 + $0x5e8] sm:$0xf]  ;;  %v4196_v45 = vld [vmem:[%s6470_s1 + $0x5f4] sm:$0xf0]  ;;  %v3360_v53 = vor.u32 %v4164_v40, %v3359_v39 }
  0xa1   :  { %v3615_v46 = vld [vmem:[%s6470_s1 + $0x6e8] sm:$0xf]  ;;  %v4228_v47 = vld [vmem:[%s6470_s1 + $0x6f4] sm:$0xf0]  ;;  %v3488_v54 = vor.u32 %v4196_v45, %v3487_v41 }
  0xa2   :  { %1912 = vmatpush.bf16.msra.mxu1 %v2896_v10  ;;  %v3743_v50 = vld [vmem:[%s6470_s1 + $0x7e8] sm:$0xf]  ;;  %v4260_v51 = vld [vmem:[%s6470_s1 + $0x7f4] sm:$0xf0]  ;;  %v3616_v55 = vor.u32 %v4228_v47, %v3615_v46 }
  0xa3   :  { %1926 = vmatpush.bf16.msra.mxu2 %v3024_v11  ;;  %v3343_v56 = vld [vmem:[%s6470_s1 + $0x4c8] sm:$0xf]  ;;  %v4160_v57 = vld [vmem:[%s6470_s1 + $0x4d4] sm:$0xf0]  ;;  %v3744_v59 = vor.u32 %v4260_v51, %v3743_v50 }
  0xa4   :  { %1940 = vmatpush.bf16.msra.mxu3 %v3152_v17  ;;  %1899 = vmatpush.bf16.msra.mxu0 %v2752_v25  ;;  %v3471_v58 = vld [vmem:[%s6470_s1 + $0x5c8] sm:$0xf]  ;;  %v4192_v60 = vld [vmem:[%s6470_s1 + $0x5d4] sm:$0xf0]  ;;  %v3344_v1 = vor.u32 %v4160_v57, %v3343_v56 }
  0xa5   :  { %v3599_v61 = vld [vmem:[%s6470_s1 + $0x6c8] sm:$0xf]  ;;  %v4224_v62 = vld [vmem:[%s6470_s1 + $0x6d4] sm:$0xf0]  ;;  %v3472_v2 = vor.u32 %v4192_v60, %v3471_v58 }
  0xa6   :  { %1913 = vmatpush.bf16.msra.mxu1 %v2880_v28  ;;  %v3727_v63 = vld [vmem:[%s6470_s1 + $0x7c8] sm:$0xf]  ;;  %v4256_v0 = vld [vmem:[%s6470_s1 + $0x7d4] sm:$0xf0]  ;;  %v3600_v3 = vor.u32 %v4224_v62, %v3599_v61 }
  0xa7   :  { %1927 = vmatpush.bf16.msra.mxu2 %v3008_v29  ;;  %v3327_v4 = vld [vmem:[%s6470_s1 + $0x4a8] sm:$0xf]  ;;  %v4156_v5 = vld [vmem:[%s6470_s1 + $0x4b4] sm:$0xf0]  ;;  %v3728_v7 = vor.u32 %v4256_v0, %v3727_v63 }
  0xa8   :  { %1941 = vmatpush.bf16.msra.mxu3 %v3136_v33  ;;  %1900 = vmatpush.bf16.msra.mxu0 %v2736_v44  ;;  %v3455_v6 = vld [vmem:[%s6470_s1 + $0x5a8] sm:$0xf]  ;;  %v4188_v8 = vld [vmem:[%s6470_s1 + $0x5b4] sm:$0xf0]  ;;  %v3328_v15 = vor.u32 %v4156_v5, %v3327_v4 }
  0xa9   :  { %v3583_v9 = vld [vmem:[%s6470_s1 + $0x6a8] sm:$0xf]  ;;  %v4220_v10 = vld [vmem:[%s6470_s1 + $0x6b4] sm:$0xf0]  ;;  %v3456_v16 = vor.u32 %v4188_v8, %v3455_v6 }
  0xaa   :  { %1914 = vmatpush.bf16.msra.mxu1 %v2864_v48  ;;  %v3711_v11 = vld [vmem:[%s6470_s1 + $0x7a8] sm:$0xf]  ;;  %v4252_v12 = vld [vmem:[%s6470_s1 + $0x7b4] sm:$0xf0]  ;;  %v3584_v17 = vor.u32 %v4220_v10, %v3583_v9 }
  0xab   :  { %1928 = vmatpush.bf16.msra.mxu2 %v2992_v49  ;;  %1901 = vmatmul.bf16.vlgmr.msra.gmra.mxu0 %v4793_v13  ;;  %v3311_v18 = vld [vmem:[%s6470_s1 + $0x488] sm:$0xf]  ;;  %v4152_v19 = vld [vmem:[%s6470_s1 + $0x494] sm:$0xf0]  ;;  %v3712_v23 = vor.u32 %v4252_v12, %v3711_v11 }
  0xac   :  { %1942 = vmatpush.bf16.msra.mxu3 %v3120_v52  ;;  %1949 = vmatpush.bf16.msrb.mxu0 %v3360_v53  ;;  %v3439_v22 = vld [vmem:[%s6470_s1 + $0x588] sm:$0xf]  ;;  %v4184_v24 = vld [vmem:[%s6470_s1 + $0x594] sm:$0xf0]  ;;  %v3312_v29 = vor.u32 %v4152_v19, %v3311_v18  ;;  %v4034_v19 = vld [vmem:[%s6470_s1 + $0xec] sm:$0xf] }
  0xad   :  { %1915 = vmatmul.bf16.vlgmr.msra.gmra.mxu1 %v4801_v20  ;;  %v3567_v25 = vld [vmem:[%s6470_s1 + $0x688] sm:$0xf]  ;;  %v4216_v26 = vld [vmem:[%s6470_s1 + $0x694] sm:$0xf0]  ;;  %v3440_v30 = vor.u32 %v4184_v24, %v3439_v22  ;;  %v2849_v22 = vld [vmem:[%s6470_s1 + $0xf8] sm:$0xf0] }
  0xae   :  { %1963 = vmatpush.bf16.msrb.mxu1 %v3488_v54  ;;  %1929 = vmatmul.bf16.vlgmr.msra.gmra.mxu2 %v4795_v14  ;;  %v3695_v27 = vld [vmem:[%s6470_s1 + $0x788] sm:$0xf]  ;;  %v4248_v28 = vld [vmem:[%s6470_s1 + $0x794] sm:$0xf0]  ;;  %v3568_v31 = vor.u32 %v4216_v26, %v3567_v25  ;;  %v2977_v25 = vld [vmem:[%s6470_s1 + $0x1f8] sm:$0xf0] }
  0xaf   :  { %1977 = vmatpush.bf16.msrb.mxu2 %v3616_v55  ;;  %1943 = vmatmul.bf16.vlgmr.msra.gmra.mxu3 %v4804_v21  ;;  %v3295_v32 = vld [vmem:[%s6470_s1 + $0x468] sm:$0xf]  ;;  %v4148_v33 = vld [vmem:[%s6470_s1 + $0x474] sm:$0xf0]  ;;  %v3696_v35 = vor.u32 %v4248_v28, %v3695_v27  ;;  %v4098_v26 = vld [vmem:[%s6470_s1 + $0x2ec] sm:$0xf] }
  0xb0   :  { %1991 = vmatpush.bf16.msrb.mxu3 %v3744_v59  ;;  %1950 = vmatpush.bf16.msrb.mxu0 %v3344_v1  ;;  %v3423_v34 = vld [vmem:[%s6470_s1 + $0x568] sm:$0xf]  ;;  %v4180_v36 = vld [vmem:[%s6470_s1 + $0x574] sm:$0xf0]  ;;  %v3296_v45 = vor.u32 %v4148_v33, %v3295_v32  ;;  %v3105_v27 = vld [vmem:[%s6470_s1 + $0x2f8] sm:$0xf0]  ;;  %v2852_v33 = vor.u32 %v4034_v19, %v2849_v22 }
  0xb1   :  { %v3551_v39 = vld [vmem:[%s6470_s1 + $0x668] sm:$0xf]  ;;  %v4212_v40 = vld [vmem:[%s6470_s1 + $0x674] sm:$0xf0]  ;;  %v3424_v46 = vor.u32 %v4180_v36, %v3423_v34  ;;  %v4030_v36 = vld [vmem:[%s6470_s1 + $0xcc] sm:$0xf] }
  0xb2   :  { %1964 = vmatpush.bf16.msrb.mxu1 %v3472_v2  ;;  %v3679_v41 = vld [vmem:[%s6470_s1 + $0x768] sm:$0xf]  ;;  %v4244_v44 = vld [vmem:[%s6470_s1 + $0x774] sm:$0xf0]  ;;  %v3552_v47 = vor.u32 %v4212_v40, %v3551_v39  ;;  %v2833_v39 = vld [vmem:[%s6470_s1 + $0xd8] sm:$0xf0] }
  0xb3   :  { %1978 = vmatpush.bf16.msrb.mxu2 %v3600_v3  ;;  %v3279_v48 = vld [vmem:[%s6470_s1 + $0x448] sm:$0xf]  ;;  %v4144_v49 = vld [vmem:[%s6470_s1 + $0x454] sm:$0xf0]  ;;  %v3680_v51 = vor.u32 %v4244_v44, %v3679_v41  ;;  %v4062_v40 = vld [vmem:[%s6470_s1 + $0x1cc] sm:$0xf] }
  0xb4   :  { %1992 = vmatpush.bf16.msrb.mxu3 %v3728_v7  ;;  %1951 = vmatpush.bf16.msrb.mxu0 %v3328_v15  ;;  %v3407_v50 = vld [vmem:[%s6470_s1 + $0x548] sm:$0xf]  ;;  %v4176_v52 = vld [vmem:[%s6470_s1 + $0x554] sm:$0xf0]  ;;  %v3280_v57 = vor.u32 %v4144_v49, %v3279_v48  ;;  %v2961_v44 = vld [vmem:[%s6470_s1 + $0x1d8] sm:$0xf0]  ;;  %v2836_v49 = vor.u32 %v4030_v36, %v2833_v39 }
  0xb5   :  { %v3535_v53 = vld [vmem:[%s6470_s1 + $0x648] sm:$0xf]  ;;  %v4208_v54 = vld [vmem:[%s6470_s1 + $0x654] sm:$0xf0]  ;;  %v3408_v58 = vor.u32 %v4176_v52, %v3407_v50  ;;  %v3217_v48 = vld [vmem:[%s6470_s1 + $0x3d8] sm:$0xf0]  ;;  %v2964_v50 = vor.u32 %v4062_v40, %v2961_v44 }
  0xb6   :  { %1965 = vmatpush.bf16.msrb.mxu1 %v3456_v16  ;;  %v3663_v55 = vld [vmem:[%s6470_s1 + $0x748] sm:$0xf]  ;;  %v4240_v56 = vld [vmem:[%s6470_s1 + $0x754] sm:$0xf0]  ;;  %v3536_v59 = vor.u32 %v4208_v54, %v3535_v53  ;;  %v4026_v52 = vld [vmem:[%s6470_s1 + $0xac] sm:$0xf] }
  0xb7   :  { %1979 = vmatpush.bf16.msrb.mxu2 %v3584_v17  ;;  %v3263_v60 = vld [vmem:[%s6470_s1 + $0x428] sm:$0xf]  ;;  %v4140_v61 = vld [vmem:[%s6470_s1 + $0x434] sm:$0xf0]  ;;  %v3664_v63 = vor.u32 %v4240_v56, %v3663_v55  ;;  %v2817_v53 = vld [vmem:[%s6470_s1 + $0xb8] sm:$0xf0] }
  0xb8   :  { %1993 = vmatpush.bf16.msrb.mxu3 %v3712_v23  ;;  %1952 = vmatpush.bf16.msrb.mxu0 %v3312_v29  ;;  %v3391_v62 = vld [vmem:[%s6470_s1 + $0x528] sm:$0xf]  ;;  %v4172_v0 = vld [vmem:[%s6470_s1 + $0x534] sm:$0xf0]  ;;  %v3264_v5 = vor.u32 %v4140_v61, %v3263_v60  ;;  %v4066_v23 = vld [vmem:[%s6470_s1 + $0x1ec] sm:$0xf]  ;;  %v2820_v61 = vor.u32 %v4026_v52, %v2817_v53 }
  0xb9   :  { %v3519_v1 = vld [vmem:[%s6470_s1 + $0x628] sm:$0xf]  ;;  %v4204_v2 = vld [vmem:[%s6470_s1 + $0x634] sm:$0xf0]  ;;  %v3392_v8 = vor.u32 %v4172_v0, %v3391_v62  ;;  %v2980_v34 = vor.u32 %v4066_v23, %v2977_v25  ;;  %v4058_v54 = vld [vmem:[%s6470_s1 + $0x1ac] sm:$0xf] }
  0xba   :  { %1966 = vmatpush.bf16.msrb.mxu1 %v3440_v30  ;;  %v3647_v3 = vld [vmem:[%s6470_s1 + $0x728] sm:$0xf]  ;;  %v4236_v4 = vld [vmem:[%s6470_s1 + $0x734] sm:$0xf0]  ;;  %v3520_v9 = vor.u32 %v4204_v2, %v3519_v1  ;;  %v4130_v30 = vld [vmem:[%s6470_s1 + $0x3ec] sm:$0xf] }
  0xbb   :  { %1980 = vmatpush.bf16.msrb.mxu2 %v3568_v31  ;;  %v3247_v6 = vld [vmem:[%s6470_s1 + $0x408] sm:$0xf]  ;;  %v4136_v7 = vld [vmem:[%s6470_s1 + $0x414] sm:$0xf0]  ;;  %v3648_v15 = vor.u32 %v4236_v4, %v3647_v3  ;;  %v3233_v31 = vld [vmem:[%s6470_s1 + $0x3f8] sm:$0xf0] }
  0xbc   :  { %1994 = vmatpush.bf16.msrb.mxu3 %v3696_v35  ;;  %1953 = vmatpush.bf16.msrb.mxu0 %v3296_v45  ;;  %v3375_v10 = vld [vmem:[%s6470_s1 + $0x508] sm:$0xf]  ;;  %v4168_v11 = vld [vmem:[%s6470_s1 + $0x514] sm:$0xf0]  ;;  %v3248_v24 = vor.u32 %v4136_v7, %v3247_v6  ;;  %v3108_v35 = vor.u32 %v4098_v26, %v3105_v27  ;;  %v3236_v41 = vor.u32 %v4130_v30, %v3233_v31  ;;  %v4094_v45 = vld [vmem:[%s6470_s1 + $0x2cc] sm:$0xf] }
  0xbd   :  { %v3503_v12 = vld [vmem:[%s6470_s1 + $0x608] sm:$0xf]  ;;  %v4200_v16 = vld [vmem:[%s6470_s1 + $0x614] sm:$0xf0]  ;;  %v3376_v28 = vor.u32 %v4168_v11, %v3375_v10  ;;  %v2945_v56 = vld [vmem:[%s6470_s1 + $0x1b8] sm:$0xf0] }
  0xbe   :  { %1967 = vmatpush.bf16.msrb.mxu1 %v3424_v46  ;;  %v3631_v17 = vld [vmem:[%s6470_s1 + $0x708] sm:$0xf]  ;;  %v4232_v18 = vld [vmem:[%s6470_s1 + $0x714] sm:$0xf0]  ;;  %v3504_v29 = vor.u32 %v4200_v16, %v3503_v12  ;;  %v3089_v46 = vld [vmem:[%s6470_s1 + $0x2d8] sm:$0xf0]  ;;  %v2948_v62 = vor.u32 %v4058_v54, %v2945_v56 }
  0xbf   :  { %1981 = vmatpush.bf16.msrb.mxu2 %v3552_v47  ;;  %v3632_v32 = vor.u32 %v4232_v18, %v3631_v17  ;;  %v4126_v47 = vld [vmem:[%s6470_s1 + $0x3cc] sm:$0xf]  ;;  %v3201_v60 = vld [vmem:[%s6470_s1 + $0x3b8] sm:$0xf0] }
  0xc0   :  { %1995 = vmatpush.bf16.msrb.mxu3 %v3680_v51  ;;  %1954 = vmatpush.bf16.msrb.mxu0 %v3280_v57  ;;  %v3092_v51 = vor.u32 %v4094_v45, %v3089_v46  ;;  %v3220_v55 = vor.u32 %v4126_v47, %v3217_v48  ;;  %v4090_v57 = vld [vmem:[%s6470_s1 + $0x2ac] sm:$0xf]  ;;  %v2801_v1 = vld [vmem:[%s6470_s1 + $0x98] sm:$0xf0] }
  0xc1   :  { %v4022_v0 = vld [vmem:[%s6470_s1 + $0x8c] sm:$0xf]  ;;  %v2929_v4 = vld [vmem:[%s6470_s1 + $0x198] sm:$0xf0] }
  0xc2   :  { %1968 = vmatpush.bf16.msrb.mxu1 %v3408_v58  ;;  %v3073_v58 = vld [vmem:[%s6470_s1 + $0x2b8] sm:$0xf0]  ;;  %v4054_v2 = vld [vmem:[%s6470_s1 + $0x18c] sm:$0xf] }
  0xc3   :  { %1982 = vmatpush.bf16.msrb.mxu2 %v3536_v59  ;;  %v4122_v59 = vld [vmem:[%s6470_s1 + $0x3ac] sm:$0xf]  ;;  %v3057_v6 = vld [vmem:[%s6470_s1 + $0x298] sm:$0xf0]  ;;  %v2932_v11 = vor.u32 %v4054_v2, %v2929_v4 }
  0xc4   :  { %1996 = vmatpush.bf16.msrb.mxu3 %v3664_v63  ;;  %1955 = vmatpush.bf16.msrb.mxu0 %v3264_v5  ;;  %v3076_v63 = vor.u32 %v4090_v57, %v3073_v58  ;;  %v3204_v3 = vor.u32 %v4122_v59, %v3201_v60  ;;  %v4086_v5 = vld [vmem:[%s6470_s1 + $0x28c] sm:$0xf]  ;;  %v2785_v16 = vld [vmem:[%s6470_s1 + $0x78] sm:$0xf0] }
  0xc5   :  { %v4118_v7 = vld [vmem:[%s6470_s1 + $0x38c] sm:$0xf]  ;;  %v3060_v12 = vor.u32 %v4086_v5, %v3057_v6  ;;  %v2913_v22 = vld [vmem:[%s6470_s1 + $0x178] sm:$0xf0] }
  0xc6   :  { %1969 = vmatpush.bf16.msrb.mxu1 %v3392_v8  ;;  %v3185_v8 = vld [vmem:[%s6470_s1 + $0x398] sm:$0xf0]  ;;  %v5714_v10 = vpop.f32.mrf.mxu0  ;;  %v4050_v17 = vld [vmem:[%s6470_s1 + $0x16c] sm:$0xf] }
  0xc7   :  { %1983 = vmatpush.bf16.msrb.mxu2 %v3520_v9  ;;  %v2804_v9 = vor.u32 %v4022_v0, %v2801_v1  ;;  %v3188_v19 = vor.u32 %v4118_v7, %v3185_v8  ;;  %v4082_v23 = vld [vmem:[%s6470_s1 + $0x26c] sm:$0xf]  ;;  %v3169_v26 = vld [vmem:[%s6470_s1 + $0x378] sm:$0xf0] }
  0xc8   :  { %1997 = vmatpush.bf16.msrb.mxu3 %v3648_v15  ;;  %1956 = vmatpush.bf16.msrb.mxu0 %v3248_v24  ;;  %v4018_v15 = vld [vmem:[%s6470_s1 + $0x6c] sm:$0xf]  ;;  %v5725_v18 = vpop.f32.mrf.mxu1  ;;  %v3041_v24 = vld [vmem:[%s6470_s1 + $0x278] sm:$0xf0] }
  0xc9   :  { %v4114_v25 = vld [vmem:[%s6470_s1 + $0x36c] sm:$0xf]  ;;  %v2788_v27 = vor.u32 %v4018_v15, %v2785_v16  ;;  %v2769_v31 = vld [vmem:[%s6470_s1 + $0x58] sm:$0xf0] }
  0xca   :  { %1970 = vmatpush.bf16.msrb.mxu1 %v3376_v28  ;;  %v2916_v28 = vor.u32 %v4050_v17, %v2913_v22  ;;  %v4014_v30 = vld [vmem:[%s6470_s1 + $0x4c] sm:$0xf]  ;;  %v3025_v36 = vld [vmem:[%s6470_s1 + $0x258] sm:$0xf0] }
  0xcb   :  { %1984 = vmatpush.bf16.msrb.mxu2 %v3504_v29  ;;  %1957 = vmatmul.bf16.vlgmr.msrb.gmra.mxu0 %v4953_v37  ;;  %v3044_v29 = vor.u32 %v4082_v23, %v3041_v24  ;;  %v4110_v39 = vld [vmem:[%s6470_s1 + $0x34c] sm:$0xf]  ;;  %v3153_v40 = vld [vmem:[%s6470_s1 + $0x358] sm:$0xf0]  ;;  %v2772_v44 = vor.u32 %v4014_v30, %v2769_v31 }
  0xcc   :  { %1998 = vmatpush.bf16.msrb.mxu3 %v3632_v32  ;;  %2005 = vmatpush.bf16.msra.mxu0 %v2852_v33  ;;  %v4046_v32 = vld [vmem:[%s6470_s1 + $0x14c] sm:$0xf]  ;;  %v3172_v33 = vor.u32 %v4114_v25, %v3169_v26  ;;  %v2881_v52 = vld [vmem:[%s6470_s1 + $0x138] sm:$0xf0] }
  0xcd   :  { %1971 = vmatmul.bf16.vlgmr.msrb.gmra.mxu1 %v4958_v42  ;;  %v4010_v48 = vld [vmem:[%s6470_s1 + $0x2c] sm:$0xf]  ;;  %v3009_v54 = vld [vmem:[%s6470_s1 + $0x238] sm:$0xf0] }
  0xce   :  { %2019 = vmatpush.bf16.msra.mxu1 %v2980_v34  ;;  %1985 = vmatmul.bf16.vlgmr.msrb.gmra.mxu2 %v4955_v38  ;;  %v2897_v34 = vld [vmem:[%s6470_s1 + $0x158] sm:$0xf0]  ;;  %v5768_v45 = vpop.f32.mrf.mxu3  ;;  %v4074_v53 = vld [vmem:[%s6470_s1 + $0x22c] sm:$0xf] }
  0xcf   :  { %2033 = vmatpush.bf16.msra.mxu2 %v3108_v35  ;;  %1999 = vmatmul.bf16.vlgmr.msrb.gmra.mxu3 %v4960_v43  ;;  %v4078_v35 = vld [vmem:[%s6470_s1 + $0x24c] sm:$0xf]  ;;  %v2900_v46 = vor.u32 %v4046_v32, %v2897_v34  ;;  %v3137_v57 = vld [vmem:[%s6470_s1 + $0x338] sm:$0xf0] }
  0xd0   :  { %2047 = vmatpush.bf16.msra.mxu3 %v3236_v41  ;;  %2006 = vmatpush.bf16.msra.mxu0 %v2836_v49  ;;  %v5766_v41 = vpop.f32.mrf.mxu2  ;;  %v3028_v47 = vor.u32 %v4078_v35, %v3025_v36  ;;  %v2753_v49 = vld [vmem:[%s6470_s1 + $0x38] sm:$0xf0]  ;;  %v4106_v56 = vld [vmem:[%s6470_s1 + $0x32c] sm:$0xf]  ;;  %v5796_v58 = vpop.f32.mrf.mxu1 }
  0xd1   :  { %v2756_v59 = vor.u32 %v4010_v48, %v2753_v49  ;;  %v4006_v60 = vld [vmem:[%s6470_s1 + $0xc] sm:$0xf]  ;;  %v2865_v1 = vld [vmem:[%s6470_s1 + $0x118] sm:$0xf0] }
  0xd2   :  { %2020 = vmatpush.bf16.msra.mxu1 %v2964_v50  ;;  %v4042_v50 = vld [vmem:[%s6470_s1 + $0x12c] sm:$0xf]  ;;  %v2993_v4 = vld [vmem:[%s6470_s1 + $0x218] sm:$0xf0] }
  0xd3   :  { %2034 = vmatpush.bf16.msra.mxu2 %v3092_v51  ;;  %v3156_v51 = vor.u32 %v4110_v39, %v3153_v40  ;;  %v4038_v0 = vld [vmem:[%s6470_s1 + $0x10c] sm:$0xf]  ;;  %v3121_v6 = vld [vmem:[%s6470_s1 + $0x318] sm:$0xf0] }
  0xd4   :  { %2048 = vmatpush.bf16.msra.mxu3 %v3220_v55  ;;  %2007 = vmatpush.bf16.msra.mxu0 %v2820_v61  ;;  %v5788_v55 = vpop.f32.mrf.mxu0  ;;  %v2737_v61 = vld [vmem:[%s6470_s1 + $0x18] sm:$0xf0]  ;;  %v4070_v2 = vld [vmem:[%s6470_s1 + $0x20c] sm:$0xf]  ;;  %v2868_v17 = vor.u32 %v4038_v0, %v2865_v1 }
  0xd5   :  { %v4102_v5 = vld [vmem:[%s6470_s1 + $0x30c] sm:$0xf]  ;;  %v3361_v8 = vld [vmem:[%s6470_s1 + $0x4f8] sm:$0xf0] }
  0xd6   :  { %2021 = vmatpush.bf16.msra.mxu1 %v2948_v62  ;;  %v2884_v62 = vor.u32 %v4042_v50, %v2881_v52  ;;  %v4162_v7 = vld [vmem:[%s6470_s1 + $0x4ec] sm:$0xf]  ;;  %v3617_v16 = vld [vmem:[%s6470_s1 + $0x6f8] sm:$0xf0]  ;;  %v3124_v25 = vor.u32 %v4102_v5, %v3121_v6 }
  0xd7   :  { %2035 = vmatpush.bf16.msra.mxu2 %v3076_v63  ;;  %v3012_v63 = vor.u32 %v4074_v53, %v3009_v54  ;;  %v4226_v15 = vld [vmem:[%s6470_s1 + $0x6ec] sm:$0xf]  ;;  %v3745_v23 = vld [vmem:[%s6470_s1 + $0x7f8] sm:$0xf0]  ;;  %v3364_v26 = vor.u32 %v4162_v7, %v3361_v8 }
  0xd8   :  { %2049 = vmatpush.bf16.msra.mxu3 %v3204_v3  ;;  %2008 = vmatpush.bf16.msra.mxu0 %v2804_v9  ;;  %v3140_v3 = vor.u32 %v4106_v56, %v3137_v57  ;;  %v4194_v9 = vld [vmem:[%s6470_s1 + $0x5ec] sm:$0xf]  ;;  %v5846_v24 = vpop.f32.mrf.mxu2  ;;  %v3345_v31 = vld [vmem:[%s6470_s1 + $0x4d8] sm:$0xf0] }
  0xd9   :  { %v4258_v22 = vld [vmem:[%s6470_s1 + $0x7ec] sm:$0xf]  ;;  %v3473_v34 = vld [vmem:[%s6470_s1 + $0x5d8] sm:$0xf0] }
  0xda   :  { %2022 = vmatpush.bf16.msra.mxu1 %v2932_v11  ;;  %v2740_v11 = vor.u32 %v4006_v60, %v2737_v61  ;;  %v4158_v30 = vld [vmem:[%s6470_s1 + $0x4cc] sm:$0xf]  ;;  %v3601_v36 = vld [vmem:[%s6470_s1 + $0x6d8] sm:$0xf0] }
  0xdb   :  { %2036 = vmatpush.bf16.msra.mxu2 %v3060_v12  ;;  %v3489_v12 = vld [vmem:[%s6470_s1 + $0x5f8] sm:$0xf0]  ;;  %v4190_v32 = vld [vmem:[%s6470_s1 + $0x5cc] sm:$0xf] }
  0xdc   :  { %2050 = vmatpush.bf16.msra.mxu3 %v3188_v19  ;;  %2009 = vmatpush.bf16.msra.mxu0 %v2788_v27  ;;  %v2996_v19 = vor.u32 %v4070_v2, %v2993_v4  ;;  %v5848_v27 = vpop.f32.mrf.mxu3  ;;  %v4222_v35 = vld [vmem:[%s6470_s1 + $0x6cc] sm:$0xf]  ;;  %v5868_v39 = vpop.f32.mrf.mxu0  ;;  %v3476_v48 = vor.u32 %v4190_v32, %v3473_v34  ;;  %v3457_v54 = vld [vmem:[%s6470_s1 + $0x5b8] sm:$0xf0] }
  0xdd   :  { %v4254_v40 = vld [vmem:[%s6470_s1 + $0x7cc] sm:$0xf]  ;;  %v3604_v49 = vor.u32 %v4222_v35, %v3601_v36  ;;  %v3585_v57 = vld [vmem:[%s6470_s1 + $0x6b8] sm:$0xf0] }
  0xde   :  { %2023 = vmatpush.bf16.msra.mxu1 %v2916_v28  ;;  %v3492_v28 = vor.u32 %v4194_v9, %v3489_v12  ;;  %v4154_v50 = vld [vmem:[%s6470_s1 + $0x4ac] sm:$0xf]  ;;  %v3313_v0 = vld [vmem:[%s6470_s1 + $0x498] sm:$0xf0] }
  0xdf   :  { %2037 = vmatpush.bf16.msra.mxu2 %v3044_v29  ;;  %v3620_v29 = vor.u32 %v4226_v15, %v3617_v16  ;;  %v4186_v52 = vld [vmem:[%s6470_s1 + $0x5ac] sm:$0xf]  ;;  %v3441_v1 = vld [vmem:[%s6470_s1 + $0x598] sm:$0xf0] }
  0xe0   :  { %2051 = vmatpush.bf16.msra.mxu3 %v3172_v33  ;;  %2010 = vmatpush.bf16.msra.mxu0 %v2772_v44  ;;  %v3748_v33 = vor.u32 %v4258_v22, %v3745_v23  ;;  %v3729_v44 = vld [vmem:[%s6470_s1 + $0x7d8] sm:$0xf0]  ;;  %v4218_v56 = vld [vmem:[%s6470_s1 + $0x6ac] sm:$0xf]  ;;  %v3460_v61 = vor.u32 %v4186_v52, %v3457_v54 }
  0xe1   :  { %v3732_v53 = vor.u32 %v4254_v40, %v3729_v44  ;;  %v4214_v2 = vld [vmem:[%s6470_s1 + $0x68c] sm:$0xf]  ;;  %v3697_v6 = vld [vmem:[%s6470_s1 + $0x798] sm:$0xf0] }
  0xe2   :  { %2024 = vmatpush.bf16.msra.mxu1 %v2900_v46  ;;  %v5876_v46 = vpop.f32.mrf.mxu1  ;;  %v4246_v5 = vld [vmem:[%s6470_s1 + $0x78c] sm:$0xf]  ;;  %v3297_v15 = vld [vmem:[%s6470_s1 + $0x478] sm:$0xf0] }
  0xe3   :  { %2038 = vmatpush.bf16.msra.mxu2 %v3028_v47  ;;  %v3348_v47 = vor.u32 %v4158_v30, %v3345_v31  ;;  %v4146_v12 = vld [vmem:[%s6470_s1 + $0x46c] sm:$0xf]  ;;  %v3425_v22 = vld [vmem:[%s6470_s1 + $0x578] sm:$0xf0] }
  0xe4   :  { %2052 = vmatpush.bf16.msra.mxu3 %v3156_v51  ;;  %2011 = vmatpush.bf16.msra.mxu0 %v2756_v59  ;;  %v3329_v51 = vld [vmem:[%s6470_s1 + $0x4b8] sm:$0xf0]  ;;  %v4250_v59 = vld [vmem:[%s6470_s1 + $0x7ac] sm:$0xf]  ;;  %v5926_v4 = vpop.f32.mrf.mxu3  ;;  %v5934_v8 = vpop.f32.mrf.mxu0  ;;  %v3300_v30 = vor.u32 %v4146_v12, %v3297_v15 }
  0xe5   :  { %v3332_v60 = vor.u32 %v4154_v50, %v3329_v51  ;;  %v4178_v16 = vld [vmem:[%s6470_s1 + $0x56c] sm:$0xf]  ;;  %v3281_v34 = vld [vmem:[%s6470_s1 + $0x458] sm:$0xf0] }
  0xe6   :  { %2025 = vmatpush.bf16.msra.mxu1 %v2884_v62  ;;  %v3588_v62 = vor.u32 %v4218_v56, %v3585_v57  ;;  %v4210_v23 = vld [vmem:[%s6470_s1 + $0x66c] sm:$0xf]  ;;  %v3428_v31 = vor.u32 %v4178_v16, %v3425_v22  ;;  %v3409_v40 = vld [vmem:[%s6470_s1 + $0x558] sm:$0xf0] }
  0xe7   :  { %2039 = vmatpush.bf16.msra.mxu2 %v3012_v63  ;;  %v4150_v63 = vld [vmem:[%s6470_s1 + $0x48c] sm:$0xf]  ;;  %v3377_v15 = vld [vmem:[%s6470_s1 + $0x518] sm:$0xf0] }
  0xe8   :  { %2053 = vmatpush.bf16.msra.mxu3 %v3140_v3  ;;  %2012 = vmatpush.bf16.msra.mxu0 %v2740_v11  ;;  %v3569_v3 = vld [vmem:[%s6470_s1 + $0x698] sm:$0xf0]  ;;  %v3316_v7 = vor.u32 %v4150_v63, %v3313_v0  ;;  %v4174_v35 = vld [vmem:[%s6470_s1 + $0x54c] sm:$0xf] }
  0xe9   :  { %v3572_v11 = vor.u32 %v4214_v2, %v3569_v3  ;;  %v4206_v44 = vld [vmem:[%s6470_s1 + $0x64c] sm:$0xf]  ;;  %v3412_v54 = vor.u32 %v4174_v35, %v3409_v40  ;;  %v3393_v63 = vld [vmem:[%s6470_s1 + $0x538] sm:$0xf0] }
  0xea   :  { %2026 = vmatpush.bf16.msra.mxu1 %v2868_v17  ;;  %v5945_v17 = vpop.f32.mrf.mxu1  ;;  %v4202_v0 = vld [vmem:[%s6470_s1 + $0x62c] sm:$0xf]  ;;  %v3649_v2 = vld [vmem:[%s6470_s1 + $0x738] sm:$0xf0] }
  0xeb   :  { %2040 = vmatpush.bf16.msra.mxu2 %v2996_v19  ;;  %2013 = vmatmul.bf16.vlgmr.msra.gmra.mxu0 %v4793_v13  ;;  %v4182_v13 = vld [vmem:[%s6470_s1 + $0x58c] sm:$0xf]  ;;  %v3700_v19 = vor.u32 %v4246_v5, %v3697_v6  ;;  %v3505_v22 = vld [vmem:[%s6470_s1 + $0x618] sm:$0xf0] }
  0xec   :  { %2054 = vmatpush.bf16.msra.mxu3 %v3124_v25  ;;  %2061 = vmatpush.bf16.msrb.mxu0 %v3364_v26  ;;  %v3444_v9 = vor.u32 %v4182_v13, %v3441_v1  ;;  %v3553_v25 = vld [vmem:[%s6470_s1 + $0x678] sm:$0xf0]  ;;  %v4242_v26 = vld [vmem:[%s6470_s1 + $0x76c] sm:$0xf]  ;;  %v1790_v57 = vpop.f32.mrf.mxu0 }
  0xed   :  { %2027 = vmatmul.bf16.vlgmr.msra.gmra.mxu1 %v4801_v20  ;;  %v3556_v32 = vor.u32 %v4210_v23, %v3553_v25  ;;  %v3521_v13 = vld [vmem:[%s6470_s1 + $0x638] sm:$0xf0]  ;;  %v4134_v5 = vld [vmem:[%s6470_s1 + $0x40c] sm:$0xf] }
  0xee   :  { %2075 = vmatpush.bf16.msrb.mxu1 %v3492_v28  ;;  %2041 = vmatmul.bf16.vlgmr.msra.gmra.mxu2 %v4795_v14  ;;  %v3713_v14 = vld [vmem:[%s6470_s1 + $0x7b8] sm:$0xf0]  ;;  %v4166_v12 = vld [vmem:[%s6470_s1 + $0x50c] sm:$0xf] }
  0xef   :  { %2089 = vmatpush.bf16.msrb.mxu2 %v3620_v29  ;;  %2055 = vmatmul.bf16.vlgmr.msra.gmra.mxu3 %v4804_v21  ;;  %v5915_v21 = vpop.f32.mrf.mxu2  ;;  %v3716_v20 = vor.u32 %v4250_v59, %v3713_v14  ;;  %v3681_v28 = vld [vmem:[%s6470_s1 + $0x778] sm:$0xf0]  ;;  %v5965_v29 = vld [vmem:[%s6471_s2] sm:$0xf]  ;;  %v4138_v59 = vld [vmem:[%s6470_s1 + $0x42c] sm:$0xf]  ;;  %v3380_v35 = vor.u32 %v4166_v12, %v3377_v15 }
  0xf0   :  { %2103 = vmatpush.bf16.msrb.mxu3 %v3748_v33  ;;  %2062 = vmatpush.bf16.msrb.mxu0 %v3348_v47  ;;  %v4142_v33 = vld [vmem:[%s6470_s1 + $0x44c] sm:$0xf]  ;;  %v3684_v36 = vor.u32 %v4242_v26, %v3681_v28  ;;  %v3537_v47 = vld [vmem:[%s6470_s1 + $0x658] sm:$0xf0]  ;;  %v381_v50 = vperm.slane %v5965_v29, 0  ;;  %v382_v1 = vperm.slane %v5965_v29, 1 }
  0xf1   :  { %v3284_v52 = vor.u32 %v4142_v33, %v3281_v34  ;;  %v3540_v56 = vor.u32 %v4206_v44, %v3537_v47  ;;  %v3265_v14 = vld [vmem:[%s6470_s1 + $0x438] sm:$0xf0]  ;;  %v4230_v23 = vld [vmem:[%s6470_s1 + $0x70c] sm:$0xf]  ;;  %v4276_v28 = vld [vmem:[%s6472_s3 + $0x74] sm:$0xf0] }
  0xf2   :  { %2076 = vmatpush.bf16.msrb.mxu1 %v3476_v48  ;;  %v4238_v48 = vld [vmem:[%s6470_s1 + $0x74c] sm:$0xf]  ;;  %v3268_v3 = vor.u32 %v4138_v59, %v3265_v14  ;;  %v1679_v6 = vadd.f32 %v5714_v10, %v381_v50  ;;  %v1791_v25 = vadd.f32 %v1790_v57, %v382_v1  ;;  %v3633_v26 = vld [vmem:[%s6470_s1 + $0x718] sm:$0xf0] }
  0xf3   :  { %2090 = vmatpush.bf16.msrb.mxu2 %v3604_v49  ;;  %v3665_v49 = vld [vmem:[%s6470_s1 + $0x758] sm:$0xf0]  ;;  %v3636_v47 = vor.u32 %v4230_v23, %v3633_v26 }
  0xf4   :  { %2104 = vmatpush.bf16.msrb.mxu3 %v3732_v53  ;;  %2063 = vmatpush.bf16.msrb.mxu0 %v3332_v60  ;;  %v5994_v53 = vpop.f32.mrf.mxu3  ;;  %v4170_v60 = vld [vmem:[%s6470_s1 + $0x52c] sm:$0xf]  ;;  %v1693_v34 = vadd.f32 %v5725_v18, %v1679_v6  ;;  %v4274_v18 = vld [vmem:[%s6472_s3 + $0x64] sm:$0xf0] }
  0xf6   :  { %2077 = vmatpush.bf16.msrb.mxu1 %v3460_v61  ;;  %v1681_v61 = vadd.f32 %v5788_v55, %v381_v50  ;;  %v4234_v55 = vld [vmem:[%s6470_s1 + $0x72c] sm:$0xf]  ;;  %v1707_v59 = vadd.f32 %v5766_v41, %v1693_v34  ;;  %v4272_v41 = vld [vmem:[%s6472_s3 + $0x54] sm:$0xf0]  ;;  %v3935_v34 = vld [vmem:[%s6472_s3 + $0x170] sm:$0xf] }
  0xf7   :  { %2091 = vmatpush.bf16.msrb.mxu2 %v3588_v62  ;;  %v5992_v51 = vpop.f32.mrf.mxu2  ;;  %v3668_v62 = vor.u32 %v4238_v48, %v3665_v49  ;;  %v3652_v10 = vor.u32 %v4234_v55, %v3649_v2 }
  0xf8   :  { %2105 = vmatpush.bf16.msrb.mxu3 %v3716_v20  ;;  %2064 = vmatpush.bf16.msrb.mxu0 %v3316_v7  ;;  %v1804_v20 = vpop.f32.mrf.mxu1  ;;  %v3396_v7 = vor.u32 %v4170_v60, %v3393_v63  ;;  %v1695_v16 = vadd.f32 %v5796_v58, %v1681_v61  ;;  %v3807_v58 = vld [vmem:[%s6472_s3 + $0x70] sm:$0xf] }
  0xf9   :  { %v3808_v48 = vor.u32 %v4276_v28, %v3807_v58  ;;  %v1805_v49 = vadd.f32 %v1804_v20, %v1791_v25 }
  0xfa   :  { %2078 = vmatpush.bf16.msrb.mxu1 %v3444_v9  ;;  %v3524_v9 = vor.u32 %v4202_v0, %v3521_v13  ;;  %v1709_v44 = vadd.f32 %v5846_v24, %v1695_v16  ;;  %v4290_v24 = vld [vmem:[%s6472_s3 + $0xe4] sm:$0xf0]  ;;  %v3791_v0 = vld [vmem:[%s6472_s3 + $0x50] sm:$0xf]  ;;  %v1721_v13 = vadd.f32 %v5768_v45, %v1707_v59 }
  0xfb   :  { %2092 = vmatpush.bf16.msrb.mxu2 %v3572_v11  ;;  %v3249_v11 = vld [vmem:[%s6470_s1 + $0x418] sm:$0xf0]  ;;  %v3792_v20 = vor.u32 %v4272_v41, %v3791_v0  ;;  %v4270_v45 = vld [vmem:[%s6472_s3 + $0x44] sm:$0xf0] }
  0xfc   :  { %2106 = vmatpush.bf16.msrb.mxu3 %v3700_v19  ;;  %2065 = vmatpush.bf16.msrb.mxu0 %v3300_v30  ;;  %v4198_v19 = vld [vmem:[%s6470_s1 + $0x60c] sm:$0xf]  ;;  %v3252_v30 = vor.u32 %v4134_v5, %v3249_v11  ;;  %v1832_v40 = vpop.f32.mrf.mxu3  ;;  %v1723_v14 = vadd.f32 %v5848_v27, %v1709_v44  ;;  %v3855_v27 = vld [vmem:[%s6472_s3 + $0xd0] sm:$0xf]  ;;  %v3783_v5 = vld [vmem:[%s6472_s3 + $0x40] sm:$0xf]  ;;  %v1735_v6 = vadd.f32 %v5868_v39, %v1721_v13 }
  0xfd   :  { %v3839_v39 = vld [vmem:[%s6472_s3 + $0xb0] sm:$0xf]  ;;  %v4306_v59 = vld [vmem:[%s6472_s3 + $0x164] sm:$0xf0] }
  0xfe   :  { %2079 = vmatpush.bf16.msrb.mxu1 %v3428_v31  ;;  %v3871_v31 = vld [vmem:[%s6472_s3 + $0xf0] sm:$0xf]  ;;  %v1737_v55 = vadd.f32 %v5934_v8, %v1723_v14  ;;  %v4286_v8 = vld [vmem:[%s6472_s3 + $0xc4] sm:$0xf0]  ;;  %v1749_v23 = vadd.f32 %v5876_v46, %v1735_v6  ;;  %v3831_v46 = vld [vmem:[%s6472_s3 + $0xa0] sm:$0xf] }
  0xff   :  { %2093 = vmatpush.bf16.msrb.mxu2 %v3556_v32  ;;  %v4292_v32 = vld [vmem:[%s6472_s3 + $0xf4] sm:$0xf0]  ;;  %v1818_v33 = vpop.f32.mrf.mxu2  ;;  %v4262_v0 = vld [vmem:[%s6472_s3 + $0x4] sm:$0xf0] }
 0x100   :  { %2107 = vmatpush.bf16.msrb.mxu3 %v3684_v36  ;;  %2066 = vmatpush.bf16.msrb.mxu0 %v3284_v52  ;;  %v3508_v36 = vor.u32 %v4198_v19, %v3505_v22  ;;  %v3872_v50 = vor.u32 %v4292_v32, %v3871_v31  ;;  %v1792_v52 = vpop.f32.mrf.mxu0  ;;  %v1806_v57 = vpop.f32.mrf.mxu1  ;;  %v1819_v61 = vadd.f32 %v1818_v33, %v1805_v49  ;;  %v3775_v19 = vld [vmem:[%s6472_s3 + $0x30] sm:$0xf]  ;;  %v4268_v22 = vld [vmem:[%s6472_s3 + $0x34] sm:$0xf0]  ;;  %v3767_v31 = vld [vmem:[%s6472_s3 + $0x20] sm:$0xf] }
 0x101   :  { %v1751_v12 = vadd.f32 %v5945_v17, %v1737_v55  ;;  %v4284_v17 = vld [vmem:[%s6472_s3 + $0xb4] sm:$0xf0]  ;;  %v3776_v26 = vor.u32 %v4268_v22, %v3775_v19  ;;  %v4266_v32 = vld [vmem:[%s6472_s3 + $0x24] sm:$0xf0]  ;;  %v3809_v55 = vld [vmem:[%s6472_s3 + $0x78] sm:$0xf0] }
 0x102   :  { %2080 = vmatpush.bf16.msrb.mxu1 %v3412_v54  ;;  %v3799_v54 = vld [vmem:[%s6472_s3 + $0x60] sm:$0xf]  ;;  %v3768_v49 = vor.u32 %v4266_v32, %v3767_v31  ;;  %v4278_v13 = vld [vmem:[%s6472_s3 + $0x84] sm:$0xf0]  ;;  %v3801_v19 = vld [vmem:[%s6472_s3 + $0x68] sm:$0xf0] }
 0x103   :  { %2094 = vmatpush.bf16.msrb.mxu2 %v3540_v56  ;;  %v3863_v56 = vld [vmem:[%s6472_s3 + $0xe0] sm:$0xf]  ;;  %v3800_v60 = vor.u32 %v4274_v18, %v3799_v54  ;;  %v1765_v25 = vadd.f32 %v5992_v51, %v1751_v12  ;;  %v4282_v51 = vld [vmem:[%s6472_s3 + $0xa4] sm:$0xf0]  ;;  %v3759_v18 = vld [vmem:[%s6472_s3 + $0x10] sm:$0xf] }
 0x104   :  { %2108 = vmatpush.bf16.msrb.mxu3 %v3668_v62  ;;  %2067 = vmatpush.bf16.msrb.mxu0 %v3268_v3  ;;  %v1793_v62 = vadd.f32 %v1792_v52, %v382_v1  ;;  %v3864_v63 = vor.u32 %v4290_v24, %v3863_v56  ;;  %v1834_v3 = vpop.f32.mrf.mxu3  ;;  %v3832_v54 = vor.u32 %v4282_v51, %v3831_v46  ;;  %v4264_v56 = vld [vmem:[%s6472_s3 + $0x14] sm:$0xf0]  ;;  %v4289_v22 = vld [vmem:[%s6472_s3 + $0xe4] sm:$0xf]  ;;  %v4302_v31 = vld [vmem:[%s6472_s3 + $0x144] sm:$0xf0] }
 0x105   :  { %v4280_v24 = vld [vmem:[%s6472_s3 + $0x94] sm:$0xf0]  ;;  %v3903_v32 = vld [vmem:[%s6472_s3 + $0x130] sm:$0xf]  ;;  %v4271_v51 = vld [vmem:[%s6472_s3 + $0x54] sm:$0xf] }
 0x106   :  { %2081 = vmatpush.bf16.msrb.mxu1 %v3396_v7 }
 0x107   :  { %2095 = vmatpush.bf16.msrb.mxu2 %v3524_v9  ;;  %v1820_v1 = vpop.f32.mrf.mxu2  ;;  %v3784_v9 = vor.u32 %v4270_v45, %v3783_v5  ;;  %v4291_v45 = vld [vmem:[%s6472_s3 + $0xf4] sm:$0xf] }
 0x108   :  { %2109 = vmatpush.bf16.msrb.mxu3 %v3652_v10  ;;  %2068 = vmatpush.bf16.msrb.mxu0 %v3252_v30  ;;  %v1846_v7 = vpop.f32.mrf.mxu0  ;;  %v3840_v30 = vor.u32 %v4284_v17, %v3839_v39 }
 0x10a   :  { %2082 = vmatpush.bf16.msrb.mxu1 %v3380_v35  ;;  %v1860_v11 = vpop.f32.mrf.mxu1  ;;  %v4308_v35 = vld [vmem:[%s6472_s3 + $0x174] sm:$0xf0] }
 0x10b   :  { %2096 = vmatpush.bf16.msrb.mxu2 %v3508_v36  ;;  %2069 = vmatmul.bf16.vlgmr.msrb.gmra.mxu0 %v4953_v37  ;;  %v4288_v37 = vld [vmem:[%s6472_s3 + $0xd4] sm:$0xf0]  ;;  %v1763_v36 = vadd.f32 %v5915_v21, %v1749_v23  ;;  %v3823_v21 = vld [vmem:[%s6472_s3 + $0x90] sm:$0xf]  ;;  %v3865_v23 = vld [vmem:[%s6472_s3 + $0xe8] sm:$0xf0] }
 0x10c   :  { %2110 = vmatpush.bf16.msrb.mxu3 %v3636_v47  ;;  %2535 = vmatpush.bf16.msra.mxu0 %v3808_v48  ;;  %v3856_v2 = vor.u32 %v4288_v37, %v3855_v27  ;;  %v3936_v48 = vor.u32 %v4308_v35, %v3935_v34  ;;  %v3824_v37 = vor.u32 %v4280_v24, %v3823_v21  ;;  %v3793_v34 = vld [vmem:[%s6472_s3 + $0x58] sm:$0xf0]  ;;  %v4298_v21 = vld [vmem:[%s6472_s3 + $0x124] sm:$0xf0]  ;;  %v4267_v24 = vld [vmem:[%s6472_s3 + $0x34] sm:$0xf] }
 0x10d   :  { %2083 = vmatmul.bf16.vlgmr.msrb.gmra.mxu1 %v4958_v42  ;;  %v1833_v42 = vadd.f32 %v1832_v40, %v1819_v61  ;;  %v1779_v40 = vadd.f32 %v5994_v53, %v1765_v25  ;;  %v1777_v14 = vadd.f32 %v5926_v4, %v1763_v36  ;;  %v3815_v4 = vld [vmem:[%s6472_s3 + $0x80] sm:$0xf]  ;;  %v4300_v36 = vld [vmem:[%s6472_s3 + $0x134] sm:$0xf0] }
 0x10e   :  { %2549 = vmatpush.bf16.msra.mxu1 %v3872_v50  ;;  %2097 = vmatmul.bf16.vlgmr.msrb.gmra.mxu2 %v4955_v38  ;;  %v1807_v38 = vadd.f32 %v1806_v57, %v1793_v62  ;;  %v3927_v57 = vld [vmem:[%s6472_s3 + $0x160] sm:$0xf]  ;;  %v3760_v62 = vor.u32 %v4264_v56, %v3759_v18  ;;  %v3816_v12 = vor.u32 %v4278_v13, %v3815_v4  ;;  %v3849_v18 = vld [vmem:[%s6472_s3 + $0xc8] sm:$0xf0]  ;;  %v4281_v13 = vld [vmem:[%s6472_s3 + $0xa4] sm:$0xf] }
 0x10f   :  { %2111 = vmatmul.bf16.vlgmr.msrb.gmra.mxu3 %v4960_v43  ;;  %v3847_v43 = vld [vmem:[%s6472_s3 + $0xc0] sm:$0xf]  ;;  %v1847_v16 = vadd.f32 %v1846_v7, %v1833_v42  ;;  %2563 = vmatpush.bf16.msra.mxu2 %v3936_v48  ;;  %vm2121_vm0 = vcmp.gt.f32.partialorder %v1779_v40, 0.0  ;;  %v2129_v61 = vmul.f32 0.2, %v1779_v40  ;;  %vm2117_vm1 = vcmp.gt.f32.partialorder %v1777_v14, 0.0 }
 0x110   :  { %2536 = vmatpush.bf16.msra.mxu0 %v3800_v60  ;;  %v1821_v15 = vadd.f32 %v1820_v1, %v1807_v38  ;;  %v3848_v10 = vor.u32 %v4286_v8, %v3847_v43  ;;  %v1848_v44 = vpop.f32.mrf.mxu0  ;;  %v3928_v60 = vor.u32 %v4306_v59, %v3927_v57  ;;  %v3919_v42 = vld [vmem:[%s6472_s3 + $0x150] sm:$0xf]  ;;  %v4304_v38 = vld [vmem:[%s6472_s3 + $0x154] sm:$0xf0]  ;;  %v3873_v43 = vld [vmem:[%s6472_s3 + $0xf8] sm:$0xf0]  ;;  %v3796_v48 = vor.u32 %v4271_v51, %v3793_v34 }
 0x111   :  { %v1861_v28 = vadd.f32 %v1860_v11, %v1847_v16  ;;  %v1874_v33 = vpop.f32.mrf.mxu2  ;;  %v3920_v8 = vor.u32 %v4304_v38, %v3919_v42  ;;  %v2137_v6 = vsel %vm2121_vm0, %v1779_v40, %v2129_v61  ;;  %v4273_v16 = vld [vmem:[%s6472_s3 + $0x64] sm:$0xf]  ;;  %v4287_v40 = vld [vmem:[%s6472_s3 + $0xd4] sm:$0xf]  ;;  %v3895_v56 = vld [vmem:[%s6472_s3 + $0x120] sm:$0xf] }
 0x112   :  { %2550 = vmatpush.bf16.msra.mxu1 %v3864_v63  ;;  %v1835_v58 = vadd.f32 %v1834_v3, %v1821_v15  ;;  %v1888_v47 = vpop.f32.mrf.mxu3  ;;  %v1862_v53 = vpop.f32.mrf.mxu1  ;;  %v3751_v63 = vld [vmem:[%s6472_s3] sm:$0xf]  ;;  %v3896_v57 = vor.u32 %v4298_v21, %v3895_v56  ;;  %v4296_v61 = vld [vmem:[%s6472_s3 + $0x114] sm:$0xf0]  ;;  %v3769_v4 = vld [vmem:[%s6472_s3 + $0x28] sm:$0xf0] }
 0x113   :  { %v1875_v50 = vadd.f32 %v1874_v33, %v1861_v28  ;;  %2564 = vmatpush.bf16.msra.mxu2 %v3928_v60  ;;  %v3752_v7 = vor.u32 %v4262_v0, %v3751_v63  ;;  %v3804_v28 = vor.u32 %v4273_v16, %v3801_v19  ;;  %v3868_v33 = vor.u32 %v4289_v22, %v3865_v23  ;;  %v3887_v60 = vld [vmem:[%s6472_s3 + $0x110] sm:$0xf]  ;;  %v3841_v63 = vld [vmem:[%s6472_s3 + $0xb8] sm:$0xf0]  ;;  %v4263_v42 = vld [vmem:[%s6472_s3 + $0x14] sm:$0xf] }
 0x114   :  { %2537 = vmatpush.bf16.msra.mxu0 %v3792_v20  ;;  %v1849_v52 = vadd.f32 %v1848_v44, %v1835_v58  ;;  %v4275_v20 = vld [vmem:[%s6472_s3 + $0x74] sm:$0xf]  ;;  %v3857_v44 = vld [vmem:[%s6472_s3 + $0xd8] sm:$0xf0]  ;;  %v3888_v0 = vor.u32 %v4296_v61, %v3887_v60  ;;  %v4305_v19 = vld [vmem:[%s6472_s3 + $0x164] sm:$0xf] }
 0x115   :  { %v1889_v41 = vadd.f32 %v1888_v47, %v1875_v50  ;;  %v3812_v15 = vor.u32 %v4275_v20, %v3809_v55  ;;  %v3904_v47 = vor.u32 %v4300_v36, %v3903_v32  ;;  %v4269_v50 = vld [vmem:[%s6472_s3 + $0x44] sm:$0xf]  ;;  %v3833_v20 = vld [vmem:[%s6472_s3 + $0xa8] sm:$0xf0]  ;;  %v3761_v38 = vld [vmem:[%s6472_s3 + $0x18] sm:$0xf0] }
 0x116   :  { %2551 = vmatpush.bf16.msra.mxu1 %v3856_v2  ;;  %v1863_v27 = vadd.f32 %v1862_v53, %v1849_v52  ;;  %v2125_v2 = vmul.f32 0.2, %v1777_v14  ;;  %v3785_v52 = vld [vmem:[%s6472_s3 + $0x48] sm:$0xf0]  ;;  %v3836_v55 = vor.u32 %v4281_v13, %v3833_v20  ;;  %v3921_v36 = vld [vmem:[%s6472_s3 + $0x158] sm:$0xf0] }
 0x117   :  { %2565 = vmatpush.bf16.msra.mxu2 %v3920_v8  ;;  %vm2118_vm2 = vcmp.gt.f32.partialorder %v1889_v41, 0.0  ;;  %v3788_v53 = vor.u32 %v4269_v50, %v3785_v52  ;;  %v4261_v8 = vld [vmem:[%s6472_s3 + $0x4] sm:$0xf]  ;;  %v3929_v22 = vld [vmem:[%s6472_s3 + $0x168] sm:$0xf0] }
 0x118   :  { %2538 = vmatpush.bf16.msra.mxu0 %v3784_v9  ;;  %v2126_v9 = vmul.f32 0.2, %v1889_v41  ;;  %v2133_v39 = vsel %vm2117_vm1, %v1777_v14, %v2125_v2  ;;  %v3777_v14 = vld [vmem:[%s6472_s3 + $0x38] sm:$0xf0]  ;;  %v4299_v52 = vld [vmem:[%s6472_s3 + $0x134] sm:$0xf] }
 0x119   :  { %v1876_v1 = vpop.f32.mrf.mxu2  ;;  %v6204_v25 = vpack.c.bf16 %v2137_v6, %v2133_v39  ;;  %v3753_v6 = vld [vmem:[%s6472_s3 + $0x8] sm:$0xf0]  ;;  %v4277_v39 = vld [vmem:[%s6472_s3 + $0x84] sm:$0xf] }
 0x11a   :  { %2552 = vmatpush.bf16.msra.mxu1 %v3848_v10  ;;  %v1877_v3 = vadd.f32 %v1876_v1, %v1863_v27  ;;  %v1890_v5 = vpop.f32.mrf.mxu3  ;;  %v3876_v10 = vor.u32 %v4291_v45, %v3873_v43  ;;  %v383_v45 = vperm.slane %v5965_v29, 2 }
 0x11c   :  { %2539 = vmatpush.bf16.msra.mxu0 %v3776_v26  ;;  %v1891_v11 = vadd.f32 %v1890_v5, %v1877_v3  ;;  %v2134_v26 = vsel %vm2118_vm2, %v1889_v41, %v2126_v9  ;;  %v3780_v41 = vor.u32 %v4267_v24, %v3777_v14  ;;  %v4279_v3 = vld [vmem:[%s6472_s3 + $0x94] sm:$0xf]  ;;  %v3825_v5 = vld [vmem:[%s6472_s3 + $0x98] sm:$0xf0]  ;;  %v3879_v9 = vld [vmem:[%s6472_s3 + $0x100] sm:$0xf] }
 0x11d   :  { %v3897_v24 = vld [vmem:[%s6472_s3 + $0x128] sm:$0xf0] }
 0x11e   :  { %2553 = vmatpush.bf16.msra.mxu1 %v3840_v30  ;;  %vm2122_vm3 = vcmp.gt.f32.partialorder %v1891_v11, 0.0  ;;  %v2130_v17 = vmul.f32 0.2, %v1891_v11  ;;  %v3911_v30 = vld [vmem:[%s6472_s3 + $0x140] sm:$0xf] }
 0x11f   :  { %v3912_v35 = vor.u32 %v4302_v31, %v3911_v30 }
 0x120   :  { %2540 = vmatpush.bf16.msra.mxu0 %v3768_v49  ;;  %v2138_v58 = vsel %vm2122_vm3, %v1891_v11, %v2130_v17  ;;  %v3860_v49 = vor.u32 %v4287_v40, %v3857_v44  ;;  %v4294_v11 = vld [vmem:[%s6472_s3 + $0x104] sm:$0xf0]  ;;  %v3817_v17 = vld [vmem:[%s6472_s3 + $0x88] sm:$0xf0]  ;;  %v4301_v40 = vld [vmem:[%s6472_s3 + $0x144] sm:$0xf] }
 0x121   :  { %v6215_v46 = vpack.c.bf16 %v2138_v58, %v2134_v26  ;;  %2566 = vmatpush.bf16.msra.mxu2 %v3912_v35  ;;  %v3880_v16 = vor.u32 %v4294_v11, %v3879_v9  ;;  %v3756_v58 = vor.u32 %v4261_v8, %v3753_v6  ;;  %v3820_v30 = vor.u32 %v4277_v39, %v3817_v17  ;;  %v4303_v35 = vld [vmem:[%s6472_s3 + $0x154] sm:$0xf]  ;;  %v3983_v6 = vld [vmem:[%s6472_s3 + $0x1d0] sm:$0xf] }
 0x122   :  { %2554 = vmatpush.bf16.msra.mxu1 %v3832_v54  ;;  %v4285_v54 = vld [vmem:[%s6472_s3 + $0xc4] sm:$0xf]  ;;  %v3924_v44 = vor.u32 %v4303_v35, %v3921_v36  ;;  %v4314_v35 = vld [vmem:[%s6472_s3 + $0x1a4] sm:$0xf0]  ;;  %v3951_v36 = vld [vmem:[%s6472_s3 + $0x190] sm:$0xf] }
 0x123   :  { %v3852_v59 = vor.u32 %v4285_v54, %v3849_v18  ;;  %v3905_v54 = vld [vmem:[%s6472_s3 + $0x138] sm:$0xf0] }
 0x124   :  { %2541 = vmatpush.bf16.msra.mxu0 %v3760_v62  ;;  %v4283_v62 = vld [vmem:[%s6472_s3 + $0xb4] sm:$0xf] }
 0x125   :  { %2567 = vmatpush.bf16.msra.mxu2 %v3904_v47  ;;  %v3844_v27 = vor.u32 %v4283_v62, %v3841_v63  ;;  %v3913_v47 = vld [vmem:[%s6472_s3 + $0x148] sm:$0xf0]  ;;  %v3999_v62 = vld [vmem:[%s6472_s3 + $0x1f0] sm:$0xf]  ;;  %v4324_v63 = vld [vmem:[%s6472_s3 + $0x1f4] sm:$0xf0] }
 0x126   :  { %2555 = vmatpush.bf16.msra.mxu1 %v3824_v37  ;;  %v4265_v37 = vld [vmem:[%s6472_s3 + $0x24] sm:$0xf]  ;;  %v3916_v50 = vor.u32 %v4301_v40, %v3913_v47 }
 0x127   :  { %v3772_v1 = vor.u32 %v4265_v37, %v3769_v4 }
 0x128   :  { %2542 = vmatpush.bf16.msra.mxu0 %v3752_v7  ;;  %v1902_v2 = vpop.f32.mrf.mxu0  ;;  %v3764_v7 = vor.u32 %v4263_v42, %v3761_v38 }
 0x129   :  { %2568 = vmatpush.bf16.msra.mxu2 %v3896_v57  ;;  %v1903_v26 = vadd.f32 %v1902_v2, %v383_v45  ;;  %v3991_v2 = vld [vmem:[%s6472_s3 + $0x1e0] sm:$0xf] }
 0x12a   :  { %2556 = vmatpush.bf16.msra.mxu1 %v3816_v12  ;;  %v1916_v43 = vpop.f32.mrf.mxu1  ;;  %v4307_v12 = vld [vmem:[%s6472_s3 + $0x174] sm:$0xf] }
 0x12b   :  { %2543 = vmatmul.bf16.vlgmr.msra.gmra.mxu0 %v6204_v25 }
 0x12c   :  { %2591 = vmatpush.bf16.msrb.mxu0 %v3812_v15  ;;  %v3828_v15 = vor.u32 %v4279_v3, %v3825_v5  ;;  %v4322_v3 = vld [vmem:[%s6472_s3 + $0x1e4] sm:$0xf0] }
 0x12d   :  { %2557 = vmatmul.bf16.vlgmr.msra.gmra.mxu1 %v6215_v46  ;;  %2569 = vmatpush.bf16.msra.mxu2 %v3888_v0  ;;  %v4295_v0 = vld [vmem:[%s6472_s3 + $0x114] sm:$0xf]  ;;  %v3992_v8 = vor.u32 %v4322_v3, %v3991_v2  ;;  %v3961_v2 = vld [vmem:[%s6472_s3 + $0x1a8] sm:$0xf0] }
 0x12e   :  { %2605 = vmatpush.bf16.msrb.mxu1 %v3876_v10  ;;  %v3937_v10 = vld [vmem:[%s6472_s3 + $0x178] sm:$0xf0] }
 0x12f   :  { %v3940_v23 = vor.u32 %v4307_v12, %v3937_v10  ;;  %v3975_v10 = vld [vmem:[%s6472_s3 + $0x1c0] sm:$0xf] }
 0x130   :  { %2592 = vmatpush.bf16.msrb.mxu0 %v3804_v28  ;;  %v3932_v28 = vor.u32 %v4305_v19, %v3929_v22  ;;  %v1904_v51 = vpop.f32.mrf.mxu0  ;;  %v4318_v19 = vld [vmem:[%s6472_s3 + $0x1c4] sm:$0xf0] }
 0x131   :  { %2570 = vmatpush.bf16.msra.mxu2 %v3880_v16  ;;  %v1930_v31 = vpop.f32.mrf.mxu2  ;;  %v3976_v17 = vor.u32 %v4318_v19, %v3975_v10  ;;  %v4309_v10 = vld [vmem:[%s6472_s3 + $0x184] sm:$0xf]  ;;  %v3945_v19 = vld [vmem:[%s6472_s3 + $0x188] sm:$0xf0] }
 0x132   :  { %2606 = vmatpush.bf16.msrb.mxu1 %v3868_v33  ;;  %v1944_v32 = vpop.f32.mrf.mxu3  ;;  %v1917_v33 = vadd.f32 %v1916_v43, %v1903_v26  ;;  %v1918_v34 = vpop.f32.mrf.mxu1  ;;  %v4316_v26 = vld [vmem:[%s6472_s3 + $0x1b4] sm:$0xf0] }
 0x134   :  { %2593 = vmatpush.bf16.msrb.mxu0 %v3796_v48  ;;  %v1931_v48 = vadd.f32 %v1930_v31, %v1917_v33 }
 0x135   :  { %2619 = vmatpush.bf16.msrb.mxu2 %v3940_v23  ;;  %v3967_v23 = vld [vmem:[%s6472_s3 + $0x1b0] sm:$0xf] }
 0x136   :  { %2607 = vmatpush.bf16.msrb.mxu1 %v3860_v49  ;;  %v1905_v49 = vadd.f32 %v1904_v51, %v383_v45  ;;  %v1945_v56 = vadd.f32 %v1944_v32, %v1931_v48  ;;  %v3968_v31 = vor.u32 %v4316_v26, %v3967_v23 }
 0x138   :  { %2594 = vmatpush.bf16.msrb.mxu0 %v3788_v53  ;;  %v1919_v21 = vadd.f32 %v1918_v34, %v1905_v49  ;;  %v3959_v34 = vld [vmem:[%s6472_s3 + $0x1a0] sm:$0xf] }
 0x139   :  { %2620 = vmatpush.bf16.msrb.mxu2 %v3932_v28  ;;  %v1932_v18 = vpop.f32.mrf.mxu2  ;;  %v3960_v40 = vor.u32 %v4314_v35, %v3959_v34  ;;  %v3943_v49 = vld [vmem:[%s6472_s3 + $0x180] sm:$0xf] }
 0x13a   :  { %2608 = vmatpush.bf16.msrb.mxu1 %v3852_v59  ;;  %v1946_v53 = vpop.f32.mrf.mxu3  ;;  %v1933_v14 = vadd.f32 %v1932_v18, %v1919_v21  ;;  %v4001_v18 = vld [vmem:[%s6472_s3 + $0x1f8] sm:$0xf0]  ;;  %v3993_v21 = vld [vmem:[%s6472_s3 + $0x1e8] sm:$0xf0] }
 0x13c   :  { %2595 = vmatpush.bf16.msrb.mxu0 %v3780_v41  ;;  %v3889_v41 = vld [vmem:[%s6472_s3 + $0x118] sm:$0xf0]  ;;  %v1947_v37 = vadd.f32 %v1946_v53, %v1933_v14 }
 0x13d   :  { %2621 = vmatpush.bf16.msrb.mxu2 %v3924_v44  ;;  %v3892_v13 = vor.u32 %v4295_v0, %v3889_v41  ;;  %v4312_v44 = vld [vmem:[%s6472_s3 + $0x194] sm:$0xf0]  ;;  %v3977_v0 = vld [vmem:[%s6472_s3 + $0x1c8] sm:$0xf0] }
 0x13e   :  { %2609 = vmatpush.bf16.msrb.mxu1 %v3844_v27  ;;  %v4000_v27 = vor.u32 %v4324_v63, %v3999_v62  ;;  %v3952_v47 = vor.u32 %v4312_v44, %v3951_v36  ;;  %v4317_v62 = vld [vmem:[%s6472_s3 + $0x1c4] sm:$0xf] }
 0x140   :  { %2596 = vmatpush.bf16.msrb.mxu0 %v3772_v1  ;;  %2577 = vmatpush.bf16.msra.mxu3 %v4000_v27  ;;  %v4293_v1 = vld [vmem:[%s6472_s3 + $0x104] sm:$0xf]  ;;  %v3980_v27 = vor.u32 %v4317_v62, %v3977_v0 }
 0x141   :  { %2622 = vmatpush.bf16.msrb.mxu2 %v3916_v50  ;;  %v4310_v50 = vld [vmem:[%s6472_s3 + $0x184] sm:$0xf0] }
 0x142   :  { %2610 = vmatpush.bf16.msrb.mxu1 %v3836_v55  ;;  %v3881_v55 = vld [vmem:[%s6472_s3 + $0x108] sm:$0xf0] }
 0x143   :  { %v3884_v43 = vor.u32 %v4293_v1, %v3881_v55 }
 0x144   :  { %2597 = vmatpush.bf16.msrb.mxu0 %v3764_v7  ;;  %v4320_v7 = vld [vmem:[%s6472_s3 + $0x1d4] sm:$0xf0]  ;;  %2578 = vmatpush.bf16.msra.mxu3 %v3992_v8 }
 0x145   :  { %v3984_v11 = vor.u32 %v4320_v7, %v3983_v6  ;;  %v4311_v7 = vld [vmem:[%s6472_s3 + $0x194] sm:$0xf] }
 0x146   :  { %2611 = vmatpush.bf16.msrb.mxu1 %v3828_v15 }
 0x148   :  { %2598 = vmatpush.bf16.msrb.mxu0 %v3756_v58  ;;  %v1958_v57 = vpop.f32.mrf.mxu0  ;;  %2579 = vmatpush.bf16.msra.mxu3 %v3984_v11 }
 0x149   :  { %v1959_v60 = vadd.f32 %v1958_v57, %v1945_v56  ;;  %v4321_v56 = vld [vmem:[%s6472_s3 + $0x1e4] sm:$0xf] }
 0x14a   :  { %2612 = vmatpush.bf16.msrb.mxu1 %v3820_v30  ;;  %v1972_v59 = vpop.f32.mrf.mxu1 }
 0x14b   :  { %2599 = vmatmul.bf16.vlgmr.msrb.gmra.mxu0 %v6204_v25  ;;  %v3908_v25 = vor.u32 %v4299_v52, %v3905_v54  ;;  %v1973_v4 = vadd.f32 %v1972_v59, %v1959_v60  ;;  %v4323_v52 = vld [vmem:[%s6472_s3 + $0x1f4] sm:$0xf]  ;;  %v3944_v54 = vor.u32 %v4310_v50, %v3943_v49 }
 0x14c   :  { %2580 = vmatpush.bf16.msra.mxu3 %v3976_v17  ;;  %v4004_v53 = vor.u32 %v4323_v52, %v4001_v18  ;;  %v4319_v60 = vld [vmem:[%s6472_s3 + $0x1d4] sm:$0xf]  ;;  %v2209_v18 = vld [vmem:[%s6473_s4] sm:$0x3] }
 0x14d   :  { %2613 = vmatmul.bf16.vlgmr.msrb.gmra.mxu1 %v6215_v46  ;;  %v4297_v46 = vld [vmem:[%s6472_s3 + $0x124] sm:$0xf]  ;;  %2623 = vmatpush.bf16.msrb.mxu2 %v3908_v25 }
 0x14e   :  { %v3900_v61 = vor.u32 %v4297_v46, %v3897_v24  ;;  %v384_v46 = vperm.slane %v5965_v29, 3  ;;  %v3996_v24 = vor.u32 %v4321_v56, %v3993_v21 }
 0x150   :  { %v1960_v42 = vpop.f32.mrf.mxu0  ;;  %2581 = vmatpush.bf16.msra.mxu3 %v3968_v31 }
 0x151   :  { %2624 = vmatpush.bf16.msrb.mxu2 %v3900_v61  ;;  %v1986_v20 = vpop.f32.mrf.mxu2  ;;  %v1961_v45 = vadd.f32 %v1960_v42, %v1947_v37  ;;  %v3985_v61 = vld [vmem:[%s6472_s3 + $0x1d8] sm:$0xf0] }
 0x152   :  { %v2000_v38 = vpop.f32.mrf.mxu3  ;;  %v1987_v5 = vadd.f32 %v1986_v20, %v1973_v4  ;;  %v1974_v9 = vpop.f32.mrf.mxu1  ;;  %v3988_v29 = vor.u32 %v4319_v60, %v3985_v61  ;;  %v4315_v4 = vld [vmem:[%s6472_s3 + $0x1b4] sm:$0xf] }
 0x153   :  { %v1975_v15 = vadd.f32 %v1974_v9, %v1961_v45  ;;  %v3953_v9 = vld [vmem:[%s6472_s3 + $0x198] sm:$0xf0] }
 0x154   :  { %v2001_v12 = vadd.f32 %v2000_v38, %v1987_v5  ;;  %2582 = vmatpush.bf16.msra.mxu3 %v3960_v40  ;;  %v4313_v38 = vld [vmem:[%s6472_s3 + $0x1a4] sm:$0xf] }
 0x155   :  { %2625 = vmatpush.bf16.msrb.mxu2 %v3892_v13  ;;  %v3969_v13 = vld [vmem:[%s6472_s3 + $0x1b8] sm:$0xf0]  ;;  %v3964_v8 = vor.u32 %v4313_v38, %v3961_v2 }
 0x156   :  { %v2127_v58 = vmul.f32 0.2, %v2001_v12  ;;  %vm2119_vm4 = vcmp.gt.f32.partialorder %v2001_v12, 0.0  ;;  %v3972_v55 = vor.u32 %v4315_v4, %v3969_v13 }
 0x158   :  { %v2135_v32 = vsel %vm2119_vm4, %v2001_v12, %v2127_v58  ;;  %2583 = vmatpush.bf16.msra.mxu3 %v3952_v47 }
 0x159   :  { %2626 = vmatpush.bf16.msrb.mxu2 %v3884_v43  ;;  %v1988_v16 = vpop.f32.mrf.mxu2 }
 0x15a   :  { %v1989_v22 = vadd.f32 %v1988_v16, %v1975_v15  ;;  %v2002_v39 = vpop.f32.mrf.mxu3  ;;  %v3956_v15 = vor.u32 %v4311_v7, %v3953_v9 }
 0x15c   :  { %v2003_v28 = vadd.f32 %v2002_v39, %v1989_v22  ;;  %2584 = vmatpush.bf16.msra.mxu3 %v3944_v54 }
 0x15e   :  { %vm2123_vm5 = vcmp.gt.f32.partialorder %v2003_v28, 0.0  ;;  %v2131_v30 = vmul.f32 0.2, %v2003_v28 }
 0x160   :  { %v2139_v33 = vsel %vm2123_vm5, %v2003_v28, %v2131_v30  ;;  %2633 = vmatpush.bf16.msrb.mxu3 %v4004_v53  ;;  %v3948_v28 = vor.u32 %v4309_v10, %v3945_v19  ;;  %v2211_v53 = vperm.slane %v2209_v18, 0 }
 0x161   :  { %v2143_v51 = vpack.c.bf16 %v2139_v33, %v2135_v32 }
 0x163   :  { %2571 = vmatmul.bf16.vlgmr.msra.gmra.mxu2 %v2143_v51 }
 0x164   :  { %2634 = vmatpush.bf16.msrb.mxu3 %v3996_v24 }
 0x168   :  { %v2014_v48 = vpop.f32.mrf.mxu0  ;;  %2635 = vmatpush.bf16.msrb.mxu3 %v3988_v29 }
 0x169   :  { %v2015_v59 = vadd.f32 %v2014_v48, %v384_v46 }
 0x16a   :  { %v2028_v25 = vpop.f32.mrf.mxu1 }
 0x16b   :  { %v2029_v41 = vadd.f32 %v2028_v25, %v2015_v59 }
 0x16c   :  { %2636 = vmatpush.bf16.msrb.mxu3 %v3980_v27 }
 0x170   :  { %v2016_v63 = vpop.f32.mrf.mxu0  ;;  %2637 = vmatpush.bf16.msrb.mxu3 %v3972_v55 }
 0x171   :  { %v2042_v57 = vpop.f32.mrf.mxu2  ;;  %v2017_v20 = vadd.f32 %v2016_v63, %v384_v46 }
 0x172   :  { %v2056_v14 = vpop.f32.mrf.mxu3  ;;  %v2030_v37 = vpop.f32.mrf.mxu1  ;;  %v2043_v1 = vadd.f32 %v2042_v57, %v2029_v41  ;;  %v2212_v57 = vperm.slane %v2209_v18, 1 }
 0x173   :  { %2627 = vmatmul.bf16.vlgmr.msrb.gmra.mxu2 %v2143_v51  ;;  %v2031_v3 = vadd.f32 %v2030_v37, %v2017_v20  ;;  %v2659_v20 = vld [vmem:[%s6474_s5] sm:$0x3] }
 0x174   :  { %v2057_v43 = vadd.f32 %v2056_v14, %v2043_v1  ;;  %2638 = vmatpush.bf16.msrb.mxu3 %v3964_v8  ;;  %v2661_v2 = vperm.slane %v2659_v20, 0 }
 0x178   :  { %2639 = vmatpush.bf16.msrb.mxu3 %v3956_v15 }
 0x179   :  { %v2044_v42 = vpop.f32.mrf.mxu2 }
 0x17a   :  { %v2058_v5 = vpop.f32.mrf.mxu3  ;;  %v2045_v11 = vadd.f32 %v2044_v42, %v2031_v3  ;;  %v2662_v3 = vperm.slane %v2659_v20, 1 }
 0x17c   :  { %v2059_v22 = vadd.f32 %v2058_v5, %v2045_v11  ;;  %2640 = vmatpush.bf16.msrb.mxu3 %v3948_v28 }
 0x188   :  { %v2070_v45 = vpop.f32.mrf.mxu0 }
 0x189   :  { %v2071_v12 = vadd.f32 %v2070_v45, %v2057_v43 }
 0x18a   :  { %v2084_v6 = vpop.f32.mrf.mxu1 }
 0x18b   :  { %v2085_v39 = vadd.f32 %v2084_v6, %v2071_v12 }
 0x190   :  { %v2072_v23 = vpop.f32.mrf.mxu0 }
 0x191   :  { %v2098_v16 = vpop.f32.mrf.mxu2  ;;  %v2073_v58 = vadd.f32 %v2072_v23, %v2059_v22 }
 0x192   :  { %v2112_v17 = vpop.f32.mrf.mxu3  ;;  %v2099_v26 = vadd.f32 %v2098_v16, %v2085_v39  ;;  %v2086_v30 = vpop.f32.mrf.mxu1 }
 0x193   :  { %v2087_v32 = vadd.f32 %v2086_v30, %v2073_v58  ;;  %v4325_v30 = vld [vmem:[#allocation2] ss:$0 sm:$0xff] }
 0x194   :  { %v2113_v31 = vadd.f32 %v2112_v17, %v2099_v26 }
 0x196   :  { %v2128_v35 = vmul.f32 0.2, %v2113_v31  ;;  %vm2120_vm6 = vcmp.gt.f32.partialorder %v2113_v31, 0.0 }
 0x198   :  { %v2136_v44 = vsel %vm2120_vm6, %v2113_v31, %v2128_v35 }
 0x199   :  { %v2100_v33 = vpop.f32.mrf.mxu2 }
 0x19a   :  { %v2101_v51 = vadd.f32 %v2100_v33, %v2087_v32  ;;  %v2114_v34 = vpop.f32.mrf.mxu3 }
 0x19c   :  { %v2115_v36 = vadd.f32 %v2114_v34, %v2101_v51 }
 0x19e   :  { %vm2124_vm7 = vcmp.gt.f32.partialorder %v2115_v36, 0.0  ;;  %v2132_v40 = vmul.f32 0.2, %v2115_v36 }
 0x1a0   :  { %v2140_v47 = vsel %vm2124_vm7, %v2115_v36, %v2132_v40 }
 0x1a1   :  { %v2144_v48 = vpack.c.bf16 %v2140_v47, %v2136_v44 }
 0x1a3   :  { %2585 = vmatmul.bf16.vlgmr.msra.gmra.mxu3 %v2144_v48 }
 0x1a8   :  { %v2544_v49 = vpop.f32.mrf.mxu0 }
 0x1a9   :  { %v2545_v24 = vadd.f32 %v2544_v49, %v2211_v53 }
 0x1aa   :  { %v2558_v52 = vpop.f32.mrf.mxu1 }
 0x1ab   :  { %v2559_v59 = vadd.f32 %v2558_v52, %v2545_v24 }
 0x1b0   :  { %v2546_v54 = vpop.f32.mrf.mxu0 }
 0x1b1   :  { %v2547_v0 = vadd.f32 %v2546_v54, %v2211_v53 }
 0x1b2   :  { %v2560_v25 = vpop.f32.mrf.mxu1 }
 0x1b3   :  { %2641 = vmatmul.bf16.vlgmr.msrb.gmra.mxu3 %v2144_v48  ;;  %v2561_v37 = vadd.f32 %v2560_v25, %v2547_v0 }
 0x1c8   :  { %v2600_v46 = vpop.f32.mrf.mxu0 }
 0x1c9   :  { %v2601_v60 = vadd.f32 %v2600_v46, %v2212_v57 }
 0x1ca   :  { %v2614_v62 = vpop.f32.mrf.mxu1 }
 0x1cb   :  { %v2615_v41 = vadd.f32 %v2614_v62, %v2601_v60 }
 0x1d0   :  { %v2602_v27 = vpop.f32.mrf.mxu0 }
 0x1d1   :  { %v2603_v55 = vadd.f32 %v2602_v27, %v2212_v57 }
 0x1d2   :  { %v2616_v8 = vpop.f32.mrf.mxu1 }
 0x1d3   :  { %v2617_v7 = vadd.f32 %v2616_v8, %v2603_v55 }
 0x1e6   :  { %v2572_v50 = vpop.f32.mrf.mxu2 }
 0x1e7   :  { %v2573_v61 = vadd.f32 %v2572_v50, %v2559_v59 }
 0x1ee   :  { %v2574_v56 = vpop.f32.mrf.mxu2 }
 0x1ef   :  { %v2575_v42 = vadd.f32 %v2574_v56, %v2561_v37 }
 0x1f6   :  { %v2628_v63 = vpop.f32.mrf.mxu2 }
 0x1f7   :  { %v2629_v4 = vadd.f32 %v2628_v63, %v2615_v41 }
 0x1fe   :  { %v2630_v6 = vpop.f32.mrf.mxu2 }
 0x1ff   :  { %v2631_v15 = vadd.f32 %v2630_v6, %v2617_v7 }
 0x226   :  { %v2586_v21 = vpop.f32.mrf.mxu3 }
 0x227   :  { %v2587_v29 = vadd.f32 %v2586_v21, %v2573_v61 }
 0x229   :  { %v2651_v13 = vmul.f32 0.2, %v2587_v29  ;;  %vm2647_vm8 = vcmp.gt.f32.partialorder %v2587_v29, 0.0 }
 0x22b   :  { %v2655_v43 = vsel %vm2647_vm8, %v2587_v29, %v2651_v13 }
 0x22c   :  { %v2665_v11 = vmul.f32 %v2661_v2, %v2655_v43 }
 0x22e   :  { %v2588_v14 = vpop.f32.mrf.mxu3 }
 0x22f   :  { %v2589_v5 = vadd.f32 %v2588_v14, %v2575_v42 }
 0x231   :  { %v2653_v16 = vmul.f32 0.2, %v2589_v5  ;;  %vm2649_vm10 = vcmp.gt.f32.partialorder %v2589_v5, 0.0 }
 0x233   :  { %v2657_v17 = vsel %vm2649_vm10, %v2589_v5, %v2653_v16 }
 0x234   :  { %v2667_v26 = vmul.f32 %v2661_v2, %v2657_v17 }
 0x236   :  { %v2642_v1 = vpop.f32.mrf.mxu3 }
 0x237   :  { %v2643_v38 = vadd.f32 %v2642_v1, %v2629_v4 }
 0x239   :  { %vm2648_vm9 = vcmp.gt.f32.partialorder %v2643_v38, 0.0  ;;  %v2652_v45 = vmul.f32 0.2, %v2643_v38 }
 0x23b   :  { %v2656_v9 = vsel %vm2648_vm9, %v2643_v38, %v2652_v45 }
 0x23c   :  { %v2666_v12 = vmul.f32 %v2662_v3, %v2656_v9 }
 0x23e   :  { %v2644_v10 = vpop.f32.mrf.mxu3  ;;  %v2669_v19 = vadd.f32 %v2666_v12, %v2665_v11 }
 0x23f   :  { %v2645_v22 = vadd.f32 %v2644_v10, %v2631_v15 }
 0x240   :  { %2670 = vadd.xlane.f32.xlu0 %v2669_v19 }
 0x241   :  { %vm2650_vm11 = vcmp.gt.f32.partialorder %v2645_v22, 0.0  ;;  %v2654_v39 = vmul.f32 0.2, %v2645_v22 }
 0x243   :  { %v2658_v23 = vsel %vm2650_vm11, %v2645_v22, %v2654_v39 }
 0x244   :  { %v2668_v58 = vmul.f32 %v2662_v3, %v2658_v23 }
 0x246   :  { %v2672_v28 = vadd.f32 %v2668_v58, %v2667_v26 }
 0x248   :  { %2673 = vadd.xlane.f32.xlu0 %v2672_v28 }
 0x2b3   :  { %v2671_v31 = vpop.xlane.xlu0 %2670 }
 0x2b4   :  { %v2679_v32 = vadd.f32 %v4325_v30, %v2671_v31 }
 0x2b6   :  { %2682 = vst.msk [vmem:[#allocation3] sm:$0xff] %vm2681_vm12, %v2679_v32 }
 0x2bb   :  { %v2674_v33 = vpop.xlane.xlu0 %2673 }
 0x2bd   :  { %v2702_v51 = vld [vmem:[#allocation3] sm:$0x3] }
 0x2be   :  { %2703 = vst [vmem:[%s6476_s7] sm:$0x3] %v2702_v51 }

</bundles_post_ra>
